<compile_context>
chip_gen: v7x
topology: tpu7x:2x2x1
jax: 0.10.0
libtpu: 0.0.40
codegen_flags: <defaults>
</compile_context>

<pallas_src>
import functools

import jax
import jax.numpy as jnp
from jax.experimental import pallas as pl
from jax.experimental.pallas import tpu as pltpu


def _shifted_softplus(x):
    # torch.nn.Softplus(beta=0.5, threshold=14):
    #   y = 2*log(1+exp(0.5*x)) if 0.5*x <= 14 else x
    z = 0.5 * x
    return jnp.where(z > 14.0, x, 2.0 * jnp.log1p(jnp.exp(jnp.minimum(z, 14.0))))


def _round_up(x, m):
    return ((x + m - 1) // m) * m


def cfconv_kernel(sched_ref, dst_ref, rbf_ref, xsrc_ref,
                  w1_ref, b1_ref, w2_ref, b2_ref, out_ref,
                  *, scatter_dtype):
    """Grid = (node_blocks, edge_steps).

    sched_ref : SMEM int32 [3, n_node_blocks]
                row 0: first edge-block index touching this node block
                row 1: last  edge-block index touching this node block
                row 2: number of valid edge steps for this node block
    dst_ref   : [1, tile_E] int32 destination ids of this edge block
    rbf_ref   : [tile_E, Rp] rbf features (compute dtype)
    xsrc_ref  : [tile_E, Dp] gathered source-node features (compute dtype)
    out_ref   : [tile_N, Dp] f32 accumulator, resident across edge steps.
    """
    nb = pl.program_id(0)
    es = pl.program_id(1)

    @pl.when(es == 0)
    def _init():
        out_ref[...] = jnp.zeros_like(out_ref)

    n_steps = sched_ref[2, nb]

    @pl.when(es < n_steps)
    def _compute():
        cdt = rbf_ref.dtype

        # Per-edge filter MLP (MXU, f32 accumulation; biases/activation in f32).
        h = jnp.dot(rbf_ref[...], w1_ref[...],
                    preferred_element_type=jnp.float32) + b1_ref[...]
        h = _shifted_softplus(h)
        h = jnp.dot(h.astype(cdt), w2_ref[...],
                    preferred_element_type=jnp.float32) + b2_ref[...]

        # Message: src-node features * edge filter (VPU, f32).
        msg = xsrc_ref[...].astype(jnp.float32) * h                  # [tE, Dp]

        # Scatter-sum onto this node block via a small local one-hot^T.
        # dst outside [nb*tile_N, (nb+1)*tile_N) (incl. padded-edge sentinel)
        # yields an all-zero column -> no contribution.  Node tiling makes the
        # iota/compare tiny relative to the matmuls (review item).
        tile_n, t_e = out_ref.shape[0], msg.shape[0]
        dst_local = dst_ref[...] - nb * tile_n                       # [1, tE]
        row_ids = jax.lax.broadcasted_iota(jnp.int32, (tile_n, t_e), 0)
        onehot_t = (row_ids == dst_local).astype(scatter_dtype)      # [tN, tE]

        out_ref[...] += jnp.dot(onehot_t, msg.astype(scatter_dtype),
                                preferred_element_type=jnp.float32)  # [tN, Dp]


def cfconv_forward(rbf, node_feat, src, dst, w1, b1, w2, b2, *,
                   compute_dtype=jnp.bfloat16, scatter_in_f32=True,
                   edge_block=512, node_block=128):
    """rbf: [E, R], node_feat: [N, D], src/dst: [E] int32,
    w1: [R, D], b1: [D], w2: [D, D], b2: [D] (weights stored as (in, out))."""
    assert edge_block % 128 == 0, "edge_block must be lane-aligned"
    assert node_block % 16 == 0, "node tile must respect bf16 sublane packing"

    E, R = rbf.shape
    N, D = node_feat.shape

    Rp = _round_up(R, 128)
    Dp = _round_up(D, 128)
    Np = _round_up(N, node_block)
    Ep = _round_up(E, edge_block)
    n_nb = Np // node_block
    n_eb = Ep // edge_block
    cdt = compute_dtype
    sdt = jnp.float32 if scatter_in_f32 else cdt

    # ---- dst-sorted edge order + per-node-block edge-range schedule --------
    perm = jnp.argsort(dst)
    dst_s = dst[perm].astype(jnp.int32)
    src_s = src[perm]
    rbf_s = rbf[perm]

    bounds = jnp.arange(n_nb + 1, dtype=jnp.int32) * node_block
    e_start = jnp.searchsorted(dst_s, bounds[:-1], side="left").astype(jnp.int32)
    e_end = jnp.searchsorted(dst_s, bounds[1:], side="left").astype(jnp.int32)
    counts = e_end - e_start
    start_blk = jnp.clip(e_start // edge_block, 0, n_eb - 1)
    last_blk = jnp.clip((e_end - 1) // edge_block, 0, n_eb - 1)
    last_blk = jnp.where(counts > 0, jnp.maximum(last_blk, start_blk), start_blk)
    n_steps = jnp.where(counts > 0, last_blk - start_blk + 1, 0).astype(jnp.int32)
    sched = jnp.stack([start_blk, last_blk, n_steps]).astype(jnp.int32)

    # Static grid extent (schedule computed eagerly in this wrapper).
    max_steps = max(int(jnp.max(n_steps)), 1)
    total_rows = max(int(jnp.sum(n_steps)), 1) * edge_block

    # ---- pad / cast kernel operands (fused gather+cast+pad passes) ---------
    # TODO(synk): gather node_feat[src] inside the kernel to drop this E x D
    # HBM round trip entirely (biggest remaining win on v5e/v6e bandwidth).
    rbf_p = jnp.zeros((Ep, Rp), cdt).at[:E, :R].set(rbf_s.astype(cdt))
    xsrc_p = jnp.zeros((Ep, Dp), cdt).at[:E, :D].set(node_feat[src_s].astype(cdt))
    # Padded edges carry sentinel dst == Np -> never matches a local row id.
    dst_p = jnp.full((1, Ep), Np, jnp.int32).at[0, :E].set(dst_s)
    w1_p = jnp.zeros((Rp, Dp), cdt).at[:R, :D].set(w1.astype(cdt))
    b1_p = jnp.zeros((1, Dp), jnp.float32).at[0, :D].set(b1.astype(jnp.float32))
    w2_p = jnp.zeros((Dp, Dp), cdt).at[:D, :D].set(w2.astype(cdt))
    b2_p = jnp.zeros((1, Dp), jnp.float32).at[0, :D].set(b2.astype(jnp.float32))

    # ---- VMEM budget + advisory cost estimate -------------------------------
    csz = jnp.dtype(cdt).itemsize
    ssz = jnp.dtype(sdt).itemsize
    vmem_est = (
        2 * edge_block * (Rp + Dp) * csz            # streamed rbf/x_src (double-buffered)
        + 2 * edge_block * 4                        # streamed dst ids
        + (Rp + Dp) * Dp * csz + 2 * Dp * 4         # resident weights / biases
        + 2 * node_block * Dp * 4                   # resident f32 accumulator (+ writeback)
        + node_block * edge_block * (4 + ssz)       # iota + one-hot intermediates
        + 3 * edge_block * Dp * 4                   # h / msg intermediates
    )
    assert vmem_est < 48 * 1024 * 1024, f"tile config needs ~{vmem_est} B of VMEM"
    vmem_limit = int(min(max(2 * vmem_est, 32 * 1024 * 1024), 64 * 1024 * 1024))

    cost = pl.CostEstimate(
        flops=int(2 * total_rows * (Rp * Dp + Dp * Dp + node_block * Dp)),
        transcendentals=int(total_rows * Dp),
        bytes_accessed=int(total_rows * (Rp + Dp) * csz
                           + (Rp + Dp) * Dp * csz
                           + Np * Dp * 4 + Ep * 4),
    )

    def _edge_blk(nb, es, s):
        # Clamp to the last valid edge block so skipped trailing steps re-use
        # the previous block (no extra DMA); pl.when skips their compute.
        return jnp.minimum(s[0, nb] + es, s[1, nb])

    kernel = functools.partial(cfconv_kernel, scatter_dtype=sdt)

    out = pl.pallas_call(
        kernel,
        out_shape=jax.ShapeDtypeStruct((Np, Dp), jnp.float32),
        grid_spec=pltpu.PrefetchScalarGridSpec(
            num_scalar_prefetch=1,
            grid=(n_nb, max_steps),
            in_specs=[
                pl.BlockSpec((1, edge_block),
                             lambda nb, es, s: (0, _edge_blk(nb, es, s))),    # dst ids
                pl.BlockSpec((edge_block, Rp),
                             lambda nb, es, s: (_edge_blk(nb, es, s), 0)),    # rbf
                pl.BlockSpec((edge_block, Dp),
                             lambda nb, es, s: (_edge_blk(nb, es, s), 0)),    # x_src
                pl.BlockSpec((Rp, Dp), lambda nb, es, s: (0, 0)),             # w1 (resident)
                pl.BlockSpec((1, Dp), lambda nb, es, s: (0, 0)),              # b1 (resident)
                pl.BlockSpec((Dp, Dp), lambda nb, es, s: (0, 0)),             # w2 (resident)
                pl.BlockSpec((1, Dp), lambda nb, es, s: (0, 0)),              # b2 (resident)
            ],
            out_specs=pl.BlockSpec((node_block, Dp),
                                   lambda nb, es, s: (nb, 0)),                # per-node-block acc
        ),
        compiler_params=pltpu.CompilerParams(
            dimension_semantics=("parallel", "arbitrary"),   # nodes parallel, edges reduce
            vmem_limit_bytes=vmem_limit,
        ),
        cost_estimate=cost,
    )(sched, dst_p, rbf_p, xsrc_p, w1_p, b1_p, w2_p, b2_p)

    return out[:N, :D]


def cfconv_reference(rbf, node_feat, src, dst, w1, b1, w2, b2):
    """Pure-JAX f32 reference matching the PyTorch module semantics."""
    h = rbf @ w1 + b1
    h = _shifted_softplus(h)
    h = h @ w2 + b2
    msg = node_feat[src] * h
    N, D = node_feat.shape
    return jnp.zeros((N, D), jnp.float32).at[dst].add(msg)


if __name__ == "__main__":
    key = jax.random.PRNGKey(0)
    ks = jax.random.split(key, 8)

    # Small synthetic graph that still exercises multiple node and edge blocks:
    # N nodes, E edges, rbf_dim=R, dim=D (SchNet default dim is 64).
    N, E, R, D = 200, 1024, 64, 64

    rbf = jax.random.normal(ks[0], (E, R), dtype=jnp.float32)
    node_feat = jax.random.normal(ks[1], (N, D), dtype=jnp.float32)
    src = jax.random.randint(ks[2], (E,), 0, N, dtype=jnp.int32)
    dst = jax.random.randint(ks[3], (E,), 0, N, dtype=jnp.int32)

    # nn.Linear(R, D) / nn.Linear(D, D) params, stored transposed as (in, out).
    w1 = jax.random.normal(ks[4], (R, D), dtype=jnp.float32) * (1.0 / R ** 0.5)
    b1 = jax.random.normal(ks[5], (D,), dtype=jnp.float32) * 0.1
    w2 = jax.random.normal(ks[6], (D, D), dtype=jnp.float32) * (1.0 / D ** 0.5)
    b2 = jax.random.normal(ks[7], (D,), dtype=jnp.float32) * 0.1

    ref = cfconv_reference(rbf, node_feat, src, dst, w1, b1, w2, b2)

    # f32 compute path (smaller edge block -> multiple edge steps per node block).
    out_f32 = cfconv_forward(rbf, node_feat, src, dst, w1, b1, w2, b2,
                             compute_dtype=jnp.float32, scatter_in_f32=True,
                             edge_block=256, node_block=128)
    out_f32 = jax.block_until_ready(out_f32)
    assert jnp.allclose(out_f32, ref, atol=1e-3, rtol=1e-3), "f32 mismatch vs reference"

    # Default perf config: bf16 MLP operands, f32 scatter operands, edge_block=512.
    out_bf16 = cfconv_forward(rbf, node_feat, src, dst, w1, b1, w2, b2,
                              compute_dtype=jnp.bfloat16, scatter_in_f32=True)
    out_bf16 = jax.block_until_ready(out_bf16)
    max_err = float(jnp.max(jnp.abs(out_bf16 - ref)))
    assert jnp.allclose(out_bf16, ref, atol=1e-1, rtol=1e-1), (
        f"bf16 mismatch vs reference (max abs err {max_err})")

    print("KERNEL_OK")
</pallas_src>

<mosaic_0001>
module attributes {stable_mosaic.version = 11 : i64} {
  func.func @cfconv_kernel(%arg0: i32, %arg1: i32, %arg2: memref<3x2xi32, #tpu.memory_space<smem>>, %arg3: memref<1x256xi32, #tpu.memory_space<vmem>>, %arg4: memref<256x128xf32, #tpu.memory_space<vmem>>, %arg5: memref<256x128xf32, #tpu.memory_space<vmem>>, %arg6: memref<128x128xf32, #tpu.memory_space<vmem>>, %arg7: memref<1x128xf32, #tpu.memory_space<vmem>>, %arg8: memref<128x128xf32, #tpu.memory_space<vmem>>, %arg9: memref<1x128xf32, #tpu.memory_space<vmem>>, %arg10: memref<128x128xf32, #tpu.memory_space<vmem>>) attributes {dimension_semantics = [#tpu.dimension_semantics<parallel>, #tpu.dimension_semantics<arbitrary>], iteration_bounds = array<i64: 2, 3>, scalar_prefetch = 1 : i64, scratch_operands = 0 : i64, tpu.core_type = #tpu.core_type<tc>, window_params = [{transform_indices = @transform_0, window_bounds = array<i64: 1, 256>}, {transform_indices = @transform_1, window_bounds = array<i64: 256, 128>}, {transform_indices = @transform_2, window_bounds = array<i64: 256, 128>}, {pipeline_mode = #tpu.pipeline_mode<synchronous>, transform_indices = @transform_3, window_bounds = array<i64: 128, 128>}, {pipeline_mode = #tpu.pipeline_mode<synchronous>, transform_indices = @transform_4, window_bounds = array<i64: 1, 128>}, {pipeline_mode = #tpu.pipeline_mode<synchronous>, transform_indices = @transform_5, window_bounds = array<i64: 128, 128>}, {pipeline_mode = #tpu.pipeline_mode<synchronous>, transform_indices = @transform_6, window_bounds = array<i64: 1, 128>}, {transform_indices = @transform_7, window_bounds = array<i64: 128, 128>}]} {
    %c0_i32 = arith.constant 0 : i32
    %0 = arith.cmpi eq, %arg1, %c0_i32 : i32
    %1 = arith.extui %0 : i1 to i32
    %c0_i32_0 = arith.constant 0 : i32
    %2 = arith.cmpi ne, %1, %c0_i32_0 : i32
    scf.if %2 {
      %cst = arith.constant 0.000000e+00 : f32
      %8 = vector.broadcast %cst : f32 to vector<128x128xf32>
      %c0 = arith.constant 0 : index
      %c0_2 = arith.constant 0 : index
      %9 = vector.load %arg10[%c0, %c0_2] : memref<128x128xf32, #tpu.memory_space<vmem>>, vector<128x128xf32>
      tpu.vector_store %arg10[%c0, %c0_2], %8 {strides = array<i32>} : memref<128x128xf32, #tpu.memory_space<vmem>>, vector<128x128xf32>,
    } else {
    }
    %c2 = arith.constant 2 : index
    %3 = arith.index_cast %arg0 : i32 to index
    %4 = memref.load %arg2[%c2, %3] : memref<3x2xi32, #tpu.memory_space<smem>>
    %5 = arith.cmpi slt, %arg1, %4 : i32
    %6 = arith.extui %5 : i1 to i32
    %c0_i32_1 = arith.constant 0 : i32
    %7 = arith.cmpi ne, %6, %c0_i32_1 : i32
    scf.if %7 {
      %c0 = arith.constant 0 : index
      %c0_2 = arith.constant 0 : index
      %8 = vector.load %arg4[%c0, %c0_2] : memref<256x128xf32, #tpu.memory_space<vmem>>, vector<256x128xf32>
      %c0_3 = arith.constant 0 : index
      %c0_4 = arith.constant 0 : index
      %9 = vector.load %arg6[%c0_3, %c0_4] : memref<128x128xf32, #tpu.memory_space<vmem>>, vector<128x128xf32>
      %cst = arith.constant dense<0.000000e+00> : vector<256x128xf32>
      %10 = tpu.matmul %8, %9, %cst {dimension_numbers = #tpu.dot_dimension_numbers<[1], [0], [0], [1], [0, 0, 1, 1], [], []>} : vector<256x128xf32>, vector<128x128xf32>, vector<256x128xf32> -> vector<256x128xf32>
      %c0_5 = arith.constant 0 : index
      %c0_6 = arith.constant 0 : index
      %11 = vector.load %arg7[%c0_5, %c0_6] : memref<1x128xf32, #tpu.memory_space<vmem>>, vector<1x128xf32>
      %12 = vector.broadcast %11 : vector<1x128xf32> to vector<256x128xf32>
      %13 = arith.addf %10, %12 : vector<256x128xf32>
      %cst_7 = arith.constant 5.000000e-01 : f32
      %14 = vector.broadcast %cst_7 : f32 to vector<256x128xf32>
      %15 = arith.mulf %14, %13 : vector<256x128xf32>
      %cst_8 = arith.constant 1.400000e+01 : f32
      %16 = vector.broadcast %cst_8 : f32 to vector<256x128xf32>
      %17 = arith.cmpf ogt, %15, %16 : vector<256x128xf32>
      %cst_9 = arith.constant 1.400000e+01 : f32
      %18 = vector.broadcast %cst_9 : f32 to vector<256x128xf32>
      %19 = arith.minimumf %15, %18 : vector<256x128xf32>
      %20 = math.exp %19 : vector<256x128xf32>
      %21 = math.log1p %20 : vector<256x128xf32>
      %cst_10 = arith.constant 2.000000e+00 : f32
      %22 = vector.broadcast %cst_10 : f32 to vector<256x128xf32>
      %23 = arith.mulf %22, %21 : vector<256x128xf32>
      %24 = arith.select %17, %13, %23 : vector<256x128xi1>, vector<256x128xf32>
      %c0_11 = arith.constant 0 : index
      %c0_12 = arith.constant 0 : index
      %25 = vector.load %arg8[%c0_11, %c0_12] : memref<128x128xf32, #tpu.memory_space<vmem>>, vector<128x128xf32>
      %cst_13 = arith.constant dense<0.000000e+00> : vector<256x128xf32>
      %26 = tpu.matmul %24, %25, %cst_13 {dimension_numbers = #tpu.dot_dimension_numbers<[1], [0], [0], [1], [0, 0, 1, 1], [], []>} : vector<256x128xf32>, vector<128x128xf32>, vector<256x128xf32> -> vector<256x128xf32>
      %c0_14 = arith.constant 0 : index
      %c0_15 = arith.constant 0 : index
      %27 = vector.load %arg9[%c0_14, %c0_15] : memref<1x128xf32, #tpu.memory_space<vmem>>, vector<1x128xf32>
      %28 = vector.broadcast %27 : vector<1x128xf32> to vector<256x128xf32>
      %29 = arith.addf %26, %28 : vector<256x128xf32>
      %c0_16 = arith.constant 0 : index
      %c0_17 = arith.constant 0 : index
      %30 = vector.load %arg5[%c0_16, %c0_17] : memref<256x128xf32, #tpu.memory_space<vmem>>, vector<256x128xf32>
      %31 = arith.mulf %30, %29 : vector<256x128xf32>
      %c0_18 = arith.constant 0 : index
      %c0_19 = arith.constant 0 : index
      %32 = vector.load %arg3[%c0_18, %c0_19] : memref<1x256xi32, #tpu.memory_space<vmem>>, vector<1x256xi32>
      %c128_i32 = arith.constant 128 : i32
      %33 = arith.muli %arg0, %c128_i32 : i32
      %34 = vector.broadcast %33 : i32 to vector<1x256xi32>
      %35 = arith.subi %32, %34 : vector<1x256xi32>
      %36 = tpu.iota {dimensions = array<i32: 0>} : vector<128x256xi32>
      %37 = vector.broadcast %35 : vector<1x256xi32> to vector<128x256xi32>
      %38 = arith.cmpi eq, %36, %37 : vector<128x256xi32>
      %39 = arith.extui %38 : vector<128x256xi1> to vector<128x256xi32>
      %40 = arith.sitofp %39 : vector<128x256xi32> to vector<128x256xf32>
      %c0_20 = arith.constant 0 : index
      %c0_21 = arith.constant 0 : index
      %41 = vector.load %arg10[%c0_20, %c0_21] : memref<128x128xf32, #tpu.memory_space<vmem>>, vector<128x128xf32>
      %cst_22 = arith.constant dense<0.000000e+00> : vector<128x128xf32>
      %42 = tpu.matmul %40, %31, %cst_22 {dimension_numbers = #tpu.dot_dimension_numbers<[1], [0], [0], [1], [0, 0, 1, 1], [], []>} : vector<128x256xf32>, vector<256x128xf32>, vector<128x128xf32> -> vector<128x128xf32>
      %43 = arith.addf %41, %42 : vector<128x128xf32>
      %c0_23 = arith.constant 0 : index
      %c0_24 = arith.constant 0 : index
      %44 = vector.load %arg10[%c0_23, %c0_24] : memref<128x128xf32, #tpu.memory_space<vmem>>, vector<128x128xf32>
      tpu.vector_store %arg10[%c0_23, %c0_24], %43 {strides = array<i32>} : memref<128x128xf32, #tpu.memory_space<vmem>>, vector<128x128xf32>,
    } else {
    }
    return
  }
  func.func @transform_0(%arg0: i32, %arg1: i32, %arg2: memref<3x2xi32, #tpu.memory_space<smem>>) -> (i32, i32) {
    %c0 = arith.constant 0 : index
    %0 = arith.index_cast %arg0 : i32 to index
    %1 = memref.load %arg2[%c0, %0] : memref<3x2xi32, #tpu.memory_space<smem>>
    %2 = arith.addi %1, %arg1 : i32
    %c1 = arith.constant 1 : index
    %3 = arith.index_cast %arg0 : i32 to index
    %4 = memref.load %arg2[%c1, %3] : memref<3x2xi32, #tpu.memory_space<smem>>
    %5 = arith.minsi %2, %4 : i32
    %c0_i32 = arith.constant 0 : i32
    %c0_i32_0 = arith.constant 0 : i32
    return %c0_i32, %5 : i32, i32
  }
  func.func @transform_1(%arg0: i32, %arg1: i32, %arg2: memref<3x2xi32, #tpu.memory_space<smem>>) -> (i32, i32) {
    %c0 = arith.constant 0 : index
    %0 = arith.index_cast %arg0 : i32 to index
    %1 = memref.load %arg2[%c0, %0] : memref<3x2xi32, #tpu.memory_space<smem>>
    %2 = arith.addi %1, %arg1 : i32
    %c1 = arith.constant 1 : index
    %3 = arith.index_cast %arg0 : i32 to index
    %4 = memref.load %arg2[%c1, %3] : memref<3x2xi32, #tpu.memory_space<smem>>
    %5 = arith.minsi %2, %4 : i32
    %c0_i32 = arith.constant 0 : i32
    %c0_i32_0 = arith.constant 0 : i32
    return %5, %c0_i32 : i32, i32
  }
  func.func @transform_2(%arg0: i32, %arg1: i32, %arg2: memref<3x2xi32, #tpu.memory_space<smem>>) -> (i32, i32) {
    %c0 = arith.constant 0 : index
    %0 = arith.index_cast %arg0 : i32 to index
    %1 = memref.load %arg2[%c0, %0] : memref<3x2xi32, #tpu.memory_space<smem>>
    %2 = arith.addi %1, %arg1 : i32
    %c1 = arith.constant 1 : index
    %3 = arith.index_cast %arg0 : i32 to index
    %4 = memref.load %arg2[%c1, %3] : memref<3x2xi32, #tpu.memory_space<smem>>
    %5 = arith.minsi %2, %4 : i32
    %c0_i32 = arith.constant 0 : i32
    %c0_i32_0 = arith.constant 0 : i32
    return %5, %c0_i32 : i32, i32
  }
  func.func @transform_3(%arg0: i32, %arg1: i32, %arg2: memref<3x2xi32, #tpu.memory_space<smem>>) -> (i32, i32) {
    %c0_i32 = arith.constant 0 : i32
    %c0_i32_0 = arith.constant 0 : i32
    %c0_i32_1 = arith.constant 0 : i32
    return %c0_i32, %c0_i32_0 : i32, i32
  }
  func.func @transform_4(%arg0: i32, %arg1: i32, %arg2: memref<3x2xi32, #tpu.memory_space<smem>>) -> (i32, i32) {
    %c0_i32 = arith.constant 0 : i32
    %c0_i32_0 = arith.constant 0 : i32
    %c0_i32_1 = arith.constant 0 : i32
    return %c0_i32, %c0_i32_0 : i32, i32
  }
  func.func @transform_5(%arg0: i32, %arg1: i32, %arg2: memref<3x2xi32, #tpu.memory_space<smem>>) -> (i32, i32) {
    %c0_i32 = arith.constant 0 : i32
    %c0_i32_0 = arith.constant 0 : i32
    %c0_i32_1 = arith.constant 0 : i32
    return %c0_i32, %c0_i32_0 : i32, i32
  }
  func.func @transform_6(%arg0: i32, %arg1: i32, %arg2: memref<3x2xi32, #tpu.memory_space<smem>>) -> (i32, i32) {
    %c0_i32 = arith.constant 0 : i32
    %c0_i32_0 = arith.constant 0 : i32
    %c0_i32_1 = arith.constant 0 : i32
    return %c0_i32, %c0_i32_0 : i32, i32
  }
  func.func @transform_7(%arg0: i32, %arg1: i32, %arg2: memref<3x2xi32, #tpu.memory_space<smem>>) -> (i32, i32) {
    %c0_i32 = arith.constant 0 : i32
    %c0_i32_0 = arith.constant 0 : i32
    return %arg0, %c0_i32 : i32, i32
  }
}

</mosaic_0001>

<bundles_post_ra>
// kernel: tpu_custom_call.1
= control target key start
LH: loop header
LB: loop body
LE: loop exit
PB: predicated region body
PF: predicated region fallthrough
CT: control target
= control target key end

     0   :  { %s5073_s0 = inlined_call_operand.vmem [shape: s32[3,2], index: 0, kind: input, shape index: {}]   ;;  %s5074_s1 = inlined_call_operand.vmem [shape: s32[1,1024], index: 1, kind: input, shape index: {}]   ;;  %s5075_s2 = inlined_call_operand.hbm [shape: f32[1024,128], index: 2, kind: input, shape index: {}]   ;;  %s5076_s3 = inlined_call_operand.hbm [shape: f32[1024,128], index: 3, kind: input, shape index: {}]   ;;  %s5077_s4 = inlined_call_operand.hbm [shape: f32[128,128], index: 4, kind: input, shape index: {}]   ;;  %s5078_s5 = inlined_call_operand.vmem [shape: f32[1,128], index: 5, kind: input, shape index: {}]   ;;  %s5079_s6 = inlined_call_operand.hbm [shape: f32[128,128], index: 6, kind: input, shape index: {}]   ;;  %s5080_s7 = inlined_call_operand.vmem [shape: f32[1,128], index: 7, kind: input, shape index: {}]   ;;  %s5081_s8 = inlined_call_operand.hbm [shape: f32[256,128], index: 8, kind: output, shape index: {}]  }
   0x1   :  { %5159 = sst [smem:[#allocation84_spill]] %s5074_s1  ;;  %s13_s29 = sshll.u32 %s5073_s0, 4  ;;  %s14_s29 = int_to_ptr.vmem [resolvable:$true] %s13_s29 }
   0x2   :  { %5160 = sst [smem:[#allocation85_spill]] %s5075_s2  ;;  %s3067_s30 = scalar_lea.vmem %s14_s29, 64 }
   0x3   :  { %5161 = sst [smem:[#allocation86_spill]] %s5077_s4  ;;  %p3068_p0 = scmp.ne.s32.totalorder %s14_s29, %s3067_s30 }
   0x4   :  { %5162 = sst [smem:[#allocation87_spill]] %s5078_s5  ;;  %p3072_p1 = scmp.lt.s32.totalorder %s14_s29, %s14_s29 }
   0x5   :  { %5163 = sst [smem:[#allocation88_spill]] %s5079_s6  ;;  %p3073_p2 = scmp.lt.s32.totalorder %s3067_s30, %s3067_s30 }
   0x6   :  { %5164 = sst [smem:[#allocation89_spill]] %s5080_s7 }
   0x7   :  { %5165 = sst [smem:[#allocation90_spill]] %s5081_s8  ;;  %p3074_p3 = por %p3073_p2, %p3072_p1 }
   0x9   :  { %p3075_p4 = pnand %p3074_p3, %p3068_p0 }
   0xb   :  { %3078 = shalt.err (!%p3075_p4)  }
   0xc   :  { %s3357_s9 = smov [#allocation3]  }
   0xd   :  { %16 = dma.vmem_to_smem %s14_s29, 64, %s3357_s9, [#allocation2] }
   0xe   :  { %3279 = dma.done.wait [#allocation2], 64 }
   0xf   :  { %3280 = vsyncadd [#allocation2], 4294967232 }
  0x10   :  { %18 = sfence }
  0x11   :  { %19 = vsyncpa [#allocation5], 0 }
  0x12   :  { %21 = vsyncpa [#allocation5 + $0x1], 0 }
  0x13   :  { %22 = vsyncpa [#allocation8], 0 }
  0x14   :  { %24 = vsyncpa [#allocation8 + $0x1], 0 }
  0x15   :  { %25 = vsyncpa [#allocation11], 0 }
  0x16   :  { %26 = vsyncpa [#allocation6], 0 }
  0x17   :  { %28 = vsyncpa [#allocation6 + $0x1], 0  ;;  %s3417_s0 = smov 0   ;;  %s3419_s10 = smov 0  }
  0x18   :  { %s3421_s11 = smov 0   ;;  %s3423_s12 = smov 0  }
  0x19   :  { %s3425_s13 = smov 0   ;;  %s3427_s14 = smov 0  }
  0x1a   :  { %s3429_s15 = smov 0   ;;  %s3431_s16 = smov 0  }
  0x1b   :  { %s3433_s17 = smov 0   ;;  %s3435_s18 = smov 0  }
  0x1c   :  { %s3437_s19 = smov 0   ;;  %s3439_s20 = smov 0  }
  0x1d   :  { %s3441_s21 = smov 0   ;;  %s3443_s22 = smov 0  }
  0x1e LB: > { %5166 = sst [smem:[#allocation27_spill]] %s3303_s0  ;;  %s3484_s23 = sadd.s32 4294967295, %s3355_s22   ;;  %s3355_s22 = sphi %s3443_s22, %s34_s22   ;;  %s3351_s21 = sphi %s3441_s21, %s5397_s21   ;;  %s3347_s20 = sphi %s3439_s20, %s5396_s20   ;;  %s3343_s19 = sphi %s3437_s19, %s5395_s19   ;;  %s3339_s18 = sphi %s3435_s18, %s5394_s18   ;;  %s3335_s17 = sphi %s3433_s17, %s5393_s17   ;;  %s3331_s16 = sphi %s3431_s16, %s5392_s16   ;;  %s3327_s15 = sphi %s3429_s15, %s5391_s15   ;;  %s3323_s14 = sphi %s3427_s14, %s5390_s14   ;;  %s3319_s13 = sphi %s3425_s13, %s5389_s13   ;;  %s3315_s12 = sphi %s3423_s12, %s5388_s12   ;;  %s3311_s11 = sphi %s3421_s11, %s5387_s11   ;;  %s3307_s10 = sphi %s3419_s10, %s5386_s10   ;;  %s3303_s0 = sphi %s3417_s0, %s5381_s0  }
  0x1f   : > { %5167 = sst [smem:[#allocation28_spill]] %s3307_s10  ;;  %p140_p5 = scmp.ne.s32.totalorder %s3331_s16, %s3327_s15 }
  0x20   : > { %5168 = sst [smem:[#allocation29_spill]] %s3339_s18  ;;  %p5087_p6 = scmp.eq.s32.totalorder %s3484_s23, 0 }
  0x21   : > { %5169 = sst [smem:[#allocation30_spill]] %s3343_s19  ;;  %s2191_s24 = sadd.s32 4294967294, %s3355_s22  }
  0x22   : > { %p190_p7 = scmp.ne.s32.totalorder %s3319_s13, %s3315_s12  ;;  %p3492_p8 = por %p5087_p6, %p140_p5 }
  0x23   : > { %p297_p9 = scmp.ne.s32.totalorder %s3311_s11, %s3307_s10  ;;  %p298_p11 = scmp.eq.s32.totalorder %s3484_s23, 5 }
  0x24   : > { %s5170_s25 = scalar_select %p3492_p8, 1, 0 }
  0x25   : > { %p3500_p10 = por %p190_p7, %p5087_p6  ;;  %p303_p12 = scmp.ne.s32.totalorder %s3307_s10, %s3303_s0 }
  0x26   : > { %p304_p13 = scmp.eq.s32.totalorder %s2191_s24, 5  ;;  %p3507_p0 = por %p298_p11, %p297_p9 }
  0x27   : > { %s5171_s26 = scalar_select %p3500_p10, 1, 0 }
  0x28   : > { %s5172_s27 = scalar_select %p3507_p0, 1, 0 }
  0x29   : > { %p2198_p1 = scmp.ge.s32.totalorder %s3355_s22, 1  ;;  %p3512_p2 = por %p304_p13, %p303_p12 }
  0x2a   : > { %5173 = sst [smem:[#allocation31_spill]] %s5172_s27  ;;  %p311_p3 = scmp.lt.s32.totalorder %s3355_s22, 7 }
  0x2b   : > { %s5174_s28 = scalar_select %p3512_p2, 1, 0 }
  0x2c   : > { %p3517_p4 = pnand %p2198_p1, %p311_p3  ;;  %s3358_s30 = smov [#allocation9]  }
  0x2d   : > { %5175 = sst [smem:[#allocation32_spill]] %s5174_s28  ;;  %s323_s9 = sshll.u32 %s3358_s30, 4  ;;  %s324_s9 = int_to_ptr.vmem [resolvable:$true] %s323_s9 }
  0x2e   : > { %s5176_s29 = scalar_select %p3517_p4, 1, 0 }
  0x2f   : > { %p2786_p5 = pneg %p3517_p4  ;;  %s3359_s15 = smov [#allocation10]  }
  0x30   : > { %s339_s24 = sshll.u32 %s3359_s15, 4  ;;  %s5178_s4 = sld [smem:[#allocation86_spill]]  ;;  %s3529_s24 = int_to_ptr.vmem [resolvable:$true] %s339_s24 }
  0x31   : > { %p3525_p7 = pnand %p2786_p5, %p5087_p6 }
  0x33   : > { %p3081_p11 = pneg %p3525_p7 }
  0x36   : > { %s3079_s8 = scalar_lea.hbm %s5178_s4, 2048 }
  0x37   : > { %p3080_p9 = scmp.ne.s32.totalorder %s5178_s4, %s3079_s8  ;;  %p3086_p1 = scmp.lt.u32.totalorder %s3079_s8, %s5178_s4 }
  0x39   : > { %p3082_p12 = pnand %p3081_p11, %p3080_p9 }
  0x3b   : > { %p3083_p13 = pneg %p3082_p12 }
  0x3d   : > { %p3088_p3 = pnand %p3086_p1, %p3083_p13 }
  0x3f   : > { %3091 = shalt.err (!%p3088_p3)
}
  0x40   : > { %s3092_s15 = scalar_lea.vmem %s324_s9, 2048  ;;  %p3100_p0 = scmp.lt.s32.totalorder %s324_s9, %s324_s9 }
  0x41   : > { %p3093_p5 = scmp.ne.s32.totalorder %s324_s9, %s3092_s15  ;;  %p3101_p10 = scmp.lt.s32.totalorder %s3092_s15, %s3092_s15 }
  0x43   : > { %p3095_p6 = pnand %p3093_p5, %p3081_p11  ;;  %p3102_p8 = por %p3101_p10, %p3100_p0 }
  0x45   : > { %p3096_p2 = pneg %p3095_p6 }
  0x47   : > { %p3103_p4 = pnand %p3102_p8, %p3096_p2 }
  0x49   : > { %3106 = shalt.err (!%p3103_p4)
}
  0x4a   : > { %s5095_s0 = smov 128   ;;  %s5097_s27 = smov 8  }
  0x4b   : > { %2789 = dma.hbm_to_vmem [thread:$0]  (!%p3525_p7), %s5178_s4, 2048, %s324_s9, [#allocation8], %s5095_s0, %s5095_s0, %s5097_s27  }
  0x4c   : > { %s5179_s6 = sld [smem:[#allocation88_spill]] }
  0x52   : > { %s3107_s30 = scalar_lea.hbm %s5179_s6, 2048 }
  0x53   : > { %p3108_p6 = scmp.ne.s32.totalorder %s5179_s6, %s3107_s30  ;;  %p3114_p0 = scmp.lt.u32.totalorder %s3107_s30, %s5179_s6 }
  0x55   : > { %p3110_p8 = pnand %p3108_p6, %p3081_p11 }
  0x57   : > { %p3111_p10 = pneg %p3110_p8 }
  0x59   : > { %p3116_p2 = pnand %p3114_p0, %p3111_p10 }
  0x5b   : > { %3119 = shalt.err (!%p3116_p2)
}
  0x5c   : > { %s3120_s9 = scalar_lea.vmem %s3529_s24, 2048  ;;  %p3128_p13 = scmp.lt.s32.totalorder %s3529_s24, %s3529_s24 }
  0x5d   : > { %p3121_p4 = scmp.ne.s32.totalorder %s3529_s24, %s3120_s9  ;;  %p3129_p1 = scmp.lt.s32.totalorder %s3120_s9, %s3120_s9 }
  0x5f   : > { %p3123_p9 = pnand %p3121_p4, %p3081_p11  ;;  %p3130_p3 = por %p3129_p1, %p3128_p13 }
  0x61   : > { %p3124_p12 = pneg %p3123_p9 }
  0x63   : > { %p3131_p5 = pnand %p3130_p3, %p3124_p12 }
  0x65   : > { %3134 = shalt.err (!%p3131_p5)
}
  0x66   : > { %2792 = dma.hbm_to_vmem [thread:$0]  (!%p3525_p7), %s5179_s6, 2048, %s3529_s24, [#allocation11], %s5095_s0, %s5095_s0, %s5097_s27  }
  0x67   : > { %s43_s18 = sadd.s32 1, %s3347_s20  ;;  %s46_s5 = sadd.s32 1, %s3351_s21 }
  0x68   : > { %p44_p11 = scmp.ge.s32.totalorder %s43_s18, 3  ;;  %s100_s7 = sld [smem:[#allocation3 + %s3351_s21]] }
  0x69   : > { %s102_s12 = sshra.s32 %s3351_s21, 7  ;;  %s107_s28 = sand.u32 127, %s3351_s21 }
  0x6a   : > { %s5399_s18 = smov (%p44_p11, %s43_s18), 0  ;;  %s5401_s5 = smov (!%p44_p11, %s46_s5), %s3351_s21 }
  0x6b   : > { %5180 = sst [smem:[#allocation33_spill]] %s5399_s18  ;;  %s2297_s8 = sshll.u32 %s102_s12, 7 }
  0x6c   : > { %p48_p6 = scmp.ge.s32.totalorder %s5401_s5, 2  ;;  %s2298_s30 = sadd.s32 128, %s2297_s8 }
  0x6d   : > { %s3593_s24 = sadd.s32 %s2298_s30, %s107_s28  ;;  %s150_s15 = sld [smem:[#allocation3 + %s3351_s21]] }
  0x6e   : > { %s5403_s5 = smov (%p48_p6, %s5401_s5), 0  ;;  %s109_s9 = sld [smem:[#allocation3 + %s3593_s24]] }
  0x6f   : > { %5181 = sst [smem:[#allocation34_spill]] %s5403_s5  ;;  %s114_s10 = sshra.s32 %s5403_s5, 7 }
  0x70   : > { %s112_s1 = sld [smem:[#allocation3 + %s5403_s5]]  ;;  %s2299_s12 = sshll.u32 %s114_s10, 7 }
  0x71   : > { %s119_s8 = sand.u32 127, %s5403_s5  ;;  %s101_s0 = sadd.s32 %s3347_s20, %s100_s7 }
  0x72   : > { %s2300_s28 = sadd.s32 128, %s2299_s12  ;;  %p5102_p7 = scmp.lt.s32.totalorder %s3355_s22, 6 }
  0x73   : > { %s120_s30 = sadd.s32 %s2300_s28, %s119_s8  ;;  %p134_p10 = scmp.ne.s32.totalorder %s3335_s17, %s3331_s16 }
  0x74   : > { %s121_s27 = sld [smem:[#allocation3 + %s120_s30]]  ;;  %p110_p8 = scmp.lt.s32.totalorder %s101_s0, %s109_s9 }
  0x75   : > { %p135_p0 = scmp.eq.s32.totalorder %s3355_s22, 0  ;;  %s159_s6 = sld [smem:[#allocation3 + %s3593_s24]] }
  0x76   : > { %s113_s4 = sadd.s32 %s112_s1, %s5399_s18  ;;  %s162_s10 = sld [smem:[#allocation3 + %s5403_s5]] }
  0x77   : > { %s3610_s19 = sld [smem:[#allocation3 + %s120_s30]]  ;;  %s5405_s0 = smov (!%p110_p8, %s101_s0), %s109_s9 }
  0x78   : > { %s284_s7 = ssub.s32 %s3351_s21, %s5403_s5  ;;  %s127_s12 = sadd.s32 1, %s3335_s17 }
  0x79   : > { %s151_s8 = sadd.s32 %s3347_s20, %s150_s15  ;;  %p3618_p4 = por %p135_p0, %p134_p10 }
  0x7a   : > { %p122_p2 = scmp.lt.s32.totalorder %s113_s4, %s121_s27  ;;  %p285_p9 = scmp.eq.s32.totalorder %s284_s7, 0 }
  0x7b   : > { %p160_p13 = scmp.lt.s32.totalorder %s151_s8, %s159_s6  ;;  %s5184_s30 = sadd.s32 1, %s3311_s11 }
  0x7c   : > { %s5407_s4 = smov (!%p122_p2, %s113_s4), %s121_s27  ;;  %s163_s28 = sadd.s32 %s162_s10, %s5399_s18 }
  0x7d   : > { %s124_s9 = ssub.s32 %s5405_s0, %s5407_s4  ;;  %p172_p1 = scmp.lt.s32.totalorder %s163_s28, %s3610_s19 }
  0x7e   : > { %p125_p12 = scmp.eq.s32.totalorder %s124_s9, 0  ;;  %s388_s27 = sand.u32 1, %s3335_s17  }
  0x7f   : > { %s3631_s7 = scalar_select %p285_p9, %s3311_s11, %s5184_s30  }
  0x80   : > { %s3626_s15 = scalar_select %p125_p12, %s3335_s17, %s127_s12  }
  0x81   : > { %5185 = sst [smem:[#allocation36_spill]] %s3631_s7  ;;  %s5409_s8 = smov (!%p160_p13, %s151_s8), %s159_s6 }
  0x82   : > { %5183 = sst [smem:[#allocation35_spill]] %s3626_s15  ;;  %p3648_p3 = pnand %p5102_p7, %p3618_p4 }
  0x83   : > { %s2768_s4 = scalar_select %p3618_p4, [#allocation3], [#allocation13] }
  0x84   : > { %s2769_s0 = scalar_select %p3618_p4, %s3351_s21, 0 }
  0x85   : > { %s5411_s4 = smov (!%p5102_p7, %s2768_s4), [#allocation17]  ;;  %s2202_s30 = sshll.u32 %s388_s27, 8 }
  0x86   : > { %s5413_s0 = smov (!%p5102_p7, %s2769_s0), 0  ;;  %s5419_s28 = smov (!%p172_p1, %s163_s28), %s3610_s19 }
  0x87   : > { %s2770_s10 = scalar_select %p3618_p4, [#allocation3], [#allocation14] }
  0x88   : > { %s393_s12 = sld [smem:[%s5411_s4 + %s5413_s0]]  ;;  %s174_s0 = ssub.s32 %s5409_s8, %s5419_s28 }
  0x89   : > { %s2771_s6 = scalar_select %p3618_p4, %s3593_s24, 0 }
  0x8a   : > { %s5415_s10 = smov (!%p5102_p7, %s2770_s10), [#allocation18]  ;;  %s177_s18 = sadd.s32 1, %s3323_s14 }
  0x8b   : > { %s5417_s6 = smov (!%p5102_p7, %s2771_s6), 0  ;;  %p175_p5 = scmp.eq.s32.totalorder %s174_s0, 0 }
  0x8c   : > { %s402_s5 = sld [smem:[%s5415_s10 + %s5417_s6]]  ;;  %p184_p11 = scmp.ne.s32.totalorder %s3323_s14, %s3319_s13 }
  0x8d   : > { %s392_s1 = scalar_lea.vmem [#allocation4], %s2202_s30  ;;  %s5188_s2 = sld [smem:[#allocation85_spill]] }
  0x8e   : > { %s394_s4 = sadd.s32 %s3347_s20, %s393_s12  ;;  %s411_s15 = sshll.u32 %s392_s1, 4  ;;  %s3671_s15 = int_to_ptr.vmem [resolvable:$true] %s411_s15 }
  0x8f   : > { %s3669_s7 = scalar_select %p175_p5, %s3323_s14, %s177_s18  }
  0x90   : > { %p3675_p8 = por %p184_p11, %p135_p0  ;;  %s423_s18 = sand.u32 1, %s3323_s14  }
  0x91   : > { %p3137_p0 = pneg %p3648_p3 }
  0x92   : > { %p403_p6 = scmp.lt.s32.totalorder %s394_s4, %s402_s5 }
  0x93   : > { %s3140_s0 = scalar_lea.hbm %s5188_s2, 16384 }
  0x94   : > { %s5421_s4 = smov (!%p403_p6, %s394_s4), %s402_s5  ;;  %s3687_s5 = scalar_lea.sflag [#allocation5], %s388_s27 }
  0x95   : > { %s2307_s19 = sshll.u32 %s5421_s4, 12 }
  0x96   : > { %s3682_s12 = scalar_lea.hbm %s5188_s2, %s2307_s19 }
  0x97   : > { %s3135_s6 = scalar_lea.hbm %s3682_s12, 4096  ;;  %p3141_p9 = scmp.lt.u32.totalorder %s3682_s12, %s5188_s2 }
  0x98   : > { %p3136_p10 = scmp.ne.s32.totalorder %s3682_s12, %s3135_s6  ;;  %p3142_p12 = scmp.lt.u32.totalorder %s3140_s0, %s3135_s6 }
  0x99   : > { %p3144_p1 = scmp.lt.u32.totalorder %s3135_s6, %s3682_s12 }
  0x9a   : > { %p3138_p2 = pnand %p3137_p0, %p3136_p10  ;;  %p3143_p13 = por %p3142_p12, %p3141_p9 }
  0x9c   : > { %p3139_p4 = pneg %p3138_p2  ;;  %p3145_p5 = por %p3144_p1, %p3143_p13 }
  0x9e   : > { %p3146_p11 = pnand %p3145_p5, %p3139_p4 }
  0xa0   : > { %3149 = shalt.err (!%p3146_p11)
}
  0xa1   : > { %s3150_s27 = scalar_lea.vmem %s3671_s15, 4096  ;;  %s3362_s8 = smov [#allocation4]  }
  0xa2   : > { %p3151_p6 = scmp.ne.s32.totalorder %s3671_s15, %s3150_s27  ;;  %s3155_s28 = sshll.u32 %s3362_s8, 4  ;;  %s3156_s28 = int_to_ptr.vmem [resolvable:$false] %s3155_s28 }
  0xa3   : > { %s3157_s30 = scalar_lea.vmem %s3156_s28, 8192  ;;  %p3158_p7 = scmp.lt.s32.totalorder %s3671_s15, %s3156_s28 }
  0xa4   : > { %p3153_p10 = pnand %p3151_p6, %p3137_p0  ;;  %p3159_p9 = scmp.lt.s32.totalorder %s3157_s30, %s3150_s27 }
  0xa6   : > { %p3154_p2 = pneg %p3153_p10  ;;  %p3160_p12 = por %p3159_p9, %p3158_p7 }
  0xa8   : > { %p3161_p13 = pnand %p3160_p12, %p3154_p2 }
  0xaa   : > { %3164 = shalt.err (!%p3161_p13)
}
  0xab   : > { %s5189_s6 = smov 8   ;;  %s5190_s4 = smov 128  }
  0xac   : > { %2800 = dma.hbm_to_vmem [thread:$0]  (!%p3648_p3), %s3682_s12, 4096, %s3671_s15, %s3687_s5, %s5190_s4, %s5190_s4, %s5189_s6  }
  0xad   : > { %s2773_s9 = scalar_select %p3675_p8, [#allocation3], [#allocation15] }
  0xae   : > { %s2774_s0 = scalar_select %p3675_p8, %s3351_s21, 0 }
  0xaf   : > { %p5191_p7 = scmp.lt.s32.totalorder %s3355_s22, 6  ;;  %s5427_s24 = smov (!%p3675_p8, %s3593_s24), 0 }
  0xb0   : > { %s2775_s1 = scalar_select %p3675_p8, [#allocation3], [#allocation16] }
  0xb1   : > { %s5423_s9 = smov (!%p5191_p7, %s2773_s9), [#allocation19]  ;;  %p5192_p0 = pmov %p5191_p7 }
  0xb2   : > { %s2206_s15 = sshll.u32 %s423_s18, 8  ;;  %s421_s8 = sand.u32 1, %s3355_s22  }
  0xb3   : > { %s5425_s0 = smov (!%p5192_p0, %s2774_s0), 0  ;;  %p5193_p4 = pmov %p5192_p0 }
  0xb4   : > { %s426_s19 = sld [smem:[%s5423_s9 + %s5425_s0]]  ;;  %p5195_p3 = pmov %p5192_p0 }
  0xb5   : > { %p3733_p1 = pnand %p5193_p4, %p3675_p8  ;;  %p5196_p5 = pmov %p5192_p0 }
  0xb6   : > { %s5429_s1 = smov (!%p5195_p3, %s2775_s1), [#allocation20]  ;;  %s425_s28 = scalar_lea.vmem [#allocation7], %s2206_s15 }
  0xb7   : > { %s5431_s24 = smov (!%p5196_p5, %s5427_s24), 0  ;;  %s444_s30 = sshll.u32 %s425_s28, 4  ;;  %s3748_s30 = int_to_ptr.vmem [resolvable:$true] %s444_s30 }
  0xb8   : > { %s435_s12 = sld [smem:[%s5429_s1 + %s5431_s24]]  ;;  %s3755_s18 = scalar_lea.sflag [#allocation8], %s421_s8 }
  0xb9   : > { %p3167_p6 = pneg %p3733_p1  ;;  %s3170_s15 = scalar_lea.hbm %s5076_s3, 16384 }
  0xba   : > { %s427_s5 = sadd.s32 %s3347_s20, %s426_s19 }
  0xbe   : > { %p436_p11 = scmp.lt.s32.totalorder %s427_s5, %s435_s12 }
  0xc0   : > { %s5433_s5 = smov (!%p436_p11, %s427_s5), %s435_s12 }
  0xc1   : > { %s2310_s9 = sshll.u32 %s5433_s5, 12 }
  0xc2   : > { %s3753_s2 = scalar_lea.hbm %s5076_s3, %s2310_s9 }
  0xc3   : > { %s3165_s24 = scalar_lea.hbm %s3753_s2, 4096  ;;  %p3171_p9 = scmp.lt.u32.totalorder %s3753_s2, %s5076_s3 }
  0xc4   : > { %p3166_p8 = scmp.ne.s32.totalorder %s3753_s2, %s3165_s24  ;;  %p3172_p12 = scmp.lt.u32.totalorder %s3170_s15, %s3165_s24 }
  0xc5   : > { %p3174_p7 = scmp.lt.u32.totalorder %s3165_s24, %s3753_s2 }
  0xc6   : > { %p3168_p10 = pnand %p3167_p6, %p3166_p8  ;;  %p3173_p13 = por %p3172_p12, %p3171_p9 }
  0xc8   : > { %p3169_p2 = pneg %p3168_p10  ;;  %p3175_p0 = por %p3174_p7, %p3173_p13 }
  0xca   : > { %p3176_p4 = pnand %p3175_p0, %p3169_p2 }
  0xcc   : > { %3179 = shalt.err (!%p3176_p4)
}
  0xcd   : > { %s3180_s8 = scalar_lea.vmem %s3748_s30, 4096  ;;  %s3363_s28 = smov [#allocation7]  }
  0xce   : > { %p3181_p3 = scmp.ne.s32.totalorder %s3748_s30, %s3180_s8  ;;  %s3185_s9 = sshll.u32 %s3363_s28, 4  ;;  %s3186_s9 = int_to_ptr.vmem [resolvable:$false] %s3185_s9 }
  0xcf   : > { %s3187_s10 = scalar_lea.vmem %s3186_s9, 8192  ;;  %p3188_p8 = scmp.lt.s32.totalorder %s3748_s30, %s3186_s9 }
  0xd0   : > { %p3183_p5 = pnand %p3181_p3, %p3167_p6  ;;  %p3189_p10 = scmp.lt.s32.totalorder %s3187_s10, %s3180_s8 }
  0xd2   : > { %p3184_p11 = pneg %p3183_p5  ;;  %p3190_p9 = por %p3189_p10, %p3188_p8 }
  0xd4   : > { %p3191_p12 = pnand %p3190_p9, %p3184_p11 }
  0xd6   : > { %3194 = shalt.err (!%p3191_p12)
}
  0xd7   : > { %2807 = dma.hbm_to_vmem [thread:$0]  (!%p3733_p1), %s3753_s2, 4096, %s3748_s30, %s3755_s18, %s5190_s4, %s5190_s4, %s5189_s6  }
  0xd8   : > { %p5197_p6 = scmp.ne.s32.totalorder %s5176_s29, 0 }
  0xd9   : > { %s458_s0 = sand.u32 (!%p5197_p6), 1, %s3331_s16   ;;  %p5198_p2 = scmp.ne.s32.totalorder (!%p5197_p6), %s5170_s25, 0 }
  0xda   : > { %456 = sbr.rel (%p5197_p6) target bundleno = 1201 (0x4b1), region = 48  ;;  %s2211_s24 = sshll.u32 (!%p5197_p6), %s458_s0, 8 }
  0xdb   : > { %s459_s1 = scalar_lea.sflag (!%p5197_p6), [#allocation5], %s458_s0  ;;  %s3789_s19 = scalar_lea.vmem (!%p5197_p6), [#allocation4], %s2211_s24 }
  0xe1   : > { %3282 = dma.done.wait (%p5198_p2), %s459_s1, 4096  }
  0xe2   : > { %3284 = vsyncadd (%p5198_p2), %s459_s1, 4294963200  ;;  %s467_s27 = sand.u32 1, %s3484_s23   ;;  %s469_s2 = sand.u32 1, %s3319_s13  }
  0xe3   : > { %s2212_s6 = sshll.u32 %s469_s2, 8  ;;  %s468_s29 = scalar_lea.sflag [#allocation8], %s467_s27 }
  0xe4   : > { %s3797_s4 = scalar_lea.vmem [#allocation7], %s2212_s6  ;;  %p5199_p1 = scmp.ne.s32.totalorder %s5171_s26, 0 }
  0xe6   : > { %3286 = dma.done.wait (%p5199_p1), %s468_s29, 4096  }
  0xe7   : > { %3288 = vsyncadd (%p5199_p1), %s468_s29, 4294963200  ;;  %p5200_p13 = scmp.eq.s32.totalorder %s3484_s23, 0 }
  0xe9   : > { %3290 = dma.done.wait (%p5200_p13), [#allocation8], 2048   ;;  %p5201_p7 = pmov %p5200_p13 }
  0xeb   : > { %3292 = vsyncadd (%p5201_p7), [#allocation8], 4294965248  ;;  %p5202_p0 = pmov %p5201_p7 }
  0xed   : > { %3294 = dma.done.wait (%p5202_p0), [#allocation11], 2048   ;;  %p5203_p4 = pmov %p5202_p0 }
  0xee   : > { %s5204_s25 = sld [smem:[#allocation30_spill]]  ;;  %s5205_s30 = sld [smem:[#allocation28_spill]] }
  0xef   : > { %3296 = vsyncadd (%p5203_p4), [#allocation11], 4294965248  ;;  %s5206_s26 = sld [smem:[#allocation29_spill]]  ;;  %s5207_s2 = sld [smem:[#allocation84_spill]] }
  0xf4   : > { %s533_s18 = sshra.s32 %s5204_s25, 7  ;;  %s538_s15 = sand.u32 127, %s5204_s25 }
  0xf5   : > { %s531_s12 = sld [smem:[#allocation3 + %s5204_s25]]  ;;  %s3814_s5 = sshll.u32 %s533_s18, 7 }
  0xf6   : > { %s2312_s8 = sadd.s32 128, %s3814_s5  ;;  %s528_s28 = sand.u32 1, %s5205_s30  }
  0xf7   : > { %s539_s9 = sadd.s32 %s2312_s8, %s538_s15  ;;  %s2215_s23 = sshll.u32 %s528_s28, 7 }
  0xf8   : > { %s540_s10 = sld [smem:[#allocation3 + %s539_s9]]  ;;  %s3829_s29 = scalar_lea.vmem [#allocation12], %s2215_s23 }
  0xf9   : > { %p2218_p11 = scmp.ne.s32.totalorder %s5206_s26, 0 }
  0xfa   : > { %v3364_v0 = vmov (!%p2218_p11), 0.0  }
  0xfb   : > { %s532_s0 = sadd.s32 %s5206_s26, %s531_s12  ;;  %591 = vst [vmem:[%s3829_s29] sm:$0xff] (!%p2218_p11), %v3364_v0  ;;  %592 = vst [vmem:[%s3829_s29 + $0x8] sm:$0xff] (!%p2218_p11), %v3364_v0 }
  0xfc   : > { %593 = vst [vmem:[%s3829_s29 + $0x10] sm:$0xff] (!%p2218_p11), %v3364_v0  ;;  %594 = vst [vmem:[%s3829_s29 + $0x18] sm:$0xff] (!%p2218_p11), %v3364_v0 }
  0xfd   : > { %595 = vst [vmem:[%s3829_s29 + $0x20] sm:$0xff] (!%p2218_p11), %v3364_v0  ;;  %596 = vst [vmem:[%s3829_s29 + $0x28] sm:$0xff] (!%p2218_p11), %v3364_v0 }
  0xfe   : > { %p541_p3 = scmp.lt.s32.totalorder %s532_s0, %s540_s10  ;;  %597 = vst [vmem:[%s3829_s29 + $0x30] sm:$0xff] (!%p2218_p11), %v3364_v0  ;;  %598 = vst [vmem:[%s3829_s29 + $0x38] sm:$0xff] (!%p2218_p11), %v3364_v0 }
  0xff   : > { %590 = sbr.rel (%p2218_p11) target bundleno = 262 (0x106), region = 68  ;;  %599 = vst [vmem:[%s3829_s29 + $0x40] sm:$0xff] (!%p2218_p11), %v3364_v0  ;;  %600 = vst [vmem:[%s3829_s29 + $0x48] sm:$0xff] (!%p2218_p11), %v3364_v0 }
 0x100   : > { %s5435_s0 = smov (!%p541_p3, %s532_s0), %s540_s10  ;;  %601 = vst [vmem:[%s3829_s29 + $0x50] sm:$0xff] (!%p2218_p11), %v3364_v0  ;;  %602 = vst [vmem:[%s3829_s29 + $0x58] sm:$0xff] (!%p2218_p11), %v3364_v0 }
 0x101   : > { %s2217_s24 = sshll.u32 %s5435_s0, 1  ;;  %603 = vst [vmem:[%s3829_s29 + $0x60] sm:$0xff] (!%p2218_p11), %v3364_v0  ;;  %604 = vst [vmem:[%s3829_s29 + $0x68] sm:$0xff] (!%p2218_p11), %v3364_v0 }
 0x102   : > { %p544_p5 = scmp.lt.s32.totalorder %s2217_s24, 7  ;;  %605 = vst [vmem:[%s3829_s29 + $0x70] sm:$0xff] (!%p2218_p11), %v3364_v0  ;;  %606 = vst [vmem:[%s3829_s29 + $0x78] sm:$0xff] (!%p2218_p11), %v3364_v0 }
 0x104   : > { %s5437_s24 = smov (!%p544_p5, %s2217_s24), 7 }
 0x105   : > { %s546_s6 = scalar_lea.vmem %s5207_s2, %s5437_s24 }
 0x106 PF: > { %s2314_s30 = sadd.s32 256, %s3814_s5  ;;  %s5209_s12 = sld [smem:[#allocation29_spill]] }
 0x107   : > { %s613_s26 = sadd.s32 %s2314_s30, %s538_s15 }
 0x108   : > { %s614_s18 = sld [smem:[#allocation3 + %s613_s26]] }
 0x10e   : > { %p2220_p8 = scmp.ge.s32.totalorder %s5209_s12, %s614_s18 }
 0x110   : > { %618 = sbr.rel (%p2220_p8) target bundleno = 1173 (0x495), region = 72 }
 0x117   : > { %v651_v1 = vld [vmem:[#allocation9] sm:$0xff]  ;;  %v652_v2 = vld [vmem:[#allocation9 + $0x8] sm:$0xff]  ;;  %v653_v3 = vld [vmem:[#allocation9 + $0x10] sm:$0xff]  ;;  %s5210_s5 = sld [smem:[#allocation87_spill]]  ;;  %s5349_s8 = sld [smem:[#allocation30_spill]] }
 0x118   : > { %v2652_v4 = vpack.c.bf16 %v652_v2, %v651_v1  ;;  %v654_v5 = vld [vmem:[#allocation9 + $0x18] sm:$0xff]  ;;  %v655_v7 = vld [vmem:[#allocation9 + $0x20] sm:$0xff]  ;;  %v656_v8 = vld [vmem:[#allocation9 + $0x28] sm:$0xff]  ;;  %s5355_s27 = sld [smem:[#allocation89_spill]] }
 0x119   : > { %v2656_v6 = vpack.c.bf16 %v654_v5, %v653_v3  ;;  %v2660_v9 = vpack.c.bf16 %v656_v8, %v655_v7  ;;  %v619_v10 = vld [vmem:[%s3789_s19] sm:$0xff]  ;;  %v657_v12 = vld [vmem:[#allocation9 + $0x30] sm:$0xff]  ;;  %v658_v13 = vld [vmem:[#allocation9 + $0x38] sm:$0xff] }
 0x11a   : > { %2653 = vmatprep.subr.bf16.mxu0 %v2652_v4  ;;  %2748 = vmatprep.subr.bf16.mxu1 %v2652_v4  ;;  %v635_v11 = vld [vmem:[%s3789_s19 + $0x80] sm:$0xff]  ;;  %v2664_v14 = vpack.c.bf16 %v658_v13, %v657_v12  ;;  %v660_v16 = vld [vmem:[#allocation9 + $0x48] sm:$0xff]  ;;  %v661_v18 = vld [vmem:[#allocation9 + $0x50] sm:$0xff] }
 0x11b   : > { %2655 = vmatpush3.bf16.msra.mxu0 %v2652_v4  ;;  %2756 = vmatpush3.bf16.msra.mxu1 %v2652_v4  ;;  %v659_v15 = vld [vmem:[#allocation9 + $0x40] sm:$0xff]  ;;  %v662_v19 = vld [vmem:[#allocation9 + $0x58] sm:$0xff]  ;;  %v664_v22 = vld [vmem:[#allocation9 + $0x68] sm:$0xff] }
 0x11c   : > { %2657 = vmatprep.subr.bf16.mxu0 %v2656_v6  ;;  %2749 = vmatprep.subr.bf16.mxu1 %v2656_v6  ;;  %v2668_v17 = vpack.c.bf16 %v660_v16, %v659_v15  ;;  %v2672_v20 = vpack.c.bf16 %v662_v19, %v661_v18  ;;  %v663_v21 = vld [vmem:[#allocation9 + $0x60] sm:$0xff]  ;;  %v665_v24 = vld [vmem:[#allocation9 + $0x70] sm:$0xff]  ;;  %v666_v25 = vld [vmem:[#allocation9 + $0x78] sm:$0xff] }
 0x11d   : > { %2524 = vmatprep.mubr.f32.mxu0 %v619_v10  ;;  %2548 = vmatprep.mubr.f32.mxu1 %v635_v11  ;;  %v2676_v23 = vpack.c.bf16 %v664_v22, %v663_v21  ;;  %v2680_v26 = vpack.c.bf16 %v666_v25, %v665_v24  ;;  %v620_v27 = vld [vmem:[%s3789_s19 + $0x8] sm:$0xff]  ;;  %v621_v29 = vld [vmem:[%s3789_s19 + $0x10] sm:$0xff]  ;;  %v622_v31 = vld [vmem:[%s3789_s19 + $0x18] sm:$0xff]  ;;  %s2223_s0 = sshll.u32 %s5349_s8, 7 }
 0x11e   : > { %v636_v28 = vld [vmem:[%s3789_s19 + $0x88] sm:$0xff]  ;;  %v637_v30 = vld [vmem:[%s3789_s19 + $0x90] sm:$0xff]  ;;  %v638_v32 = vld [vmem:[%s3789_s19 + $0x98] sm:$0xff] }
 0x11f   : > { %2659 = vmatpush3.bf16.msra.mxu0 %v2656_v6  ;;  %2757 = vmatpush3.bf16.msra.mxu1 %v2656_v6  ;;  %v623_v33 = vld [vmem:[%s3789_s19 + $0x20] sm:$0xff]  ;;  %v624_v35 = vld [vmem:[%s3789_s19 + $0x28] sm:$0xff]  ;;  %v625_v37 = vld [vmem:[%s3789_s19 + $0x30] sm:$0xff] }
 0x120   : > { %2661 = vmatprep.subr.bf16.mxu0 %v2660_v9  ;;  %2750 = vmatprep.subr.bf16.mxu1 %v2660_v9  ;;  %v639_v34 = vld [vmem:[%s3789_s19 + $0xa0] sm:$0xff]  ;;  %v640_v36 = vld [vmem:[%s3789_s19 + $0xa8] sm:$0xff]  ;;  %v641_v38 = vld [vmem:[%s3789_s19 + $0xb0] sm:$0xff] }
 0x121   : > { %v626_v39 = vld [vmem:[%s3789_s19 + $0x38] sm:$0xff]  ;;  %v627_v41 = vld [vmem:[%s3789_s19 + $0x40] sm:$0xff]  ;;  %v628_v43 = vld [vmem:[%s3789_s19 + $0x48] sm:$0xff] }
 0x122   : > { %v642_v40 = vld [vmem:[%s3789_s19 + $0xb8] sm:$0xff]  ;;  %v643_v42 = vld [vmem:[%s3789_s19 + $0xc0] sm:$0xff]  ;;  %v644_v44 = vld [vmem:[%s3789_s19 + $0xc8] sm:$0xff] }
 0x123   : > { %2663 = vmatpush3.bf16.msra.mxu0 %v2660_v9  ;;  %2758 = vmatpush3.bf16.msra.mxu1 %v2660_v9  ;;  %v629_v45 = vld [vmem:[%s3789_s19 + $0x50] sm:$0xff]  ;;  %v630_v47 = vld [vmem:[%s3789_s19 + $0x58] sm:$0xff]  ;;  %v631_v49 = vld [vmem:[%s3789_s19 + $0x60] sm:$0xff] }
 0x124   : > { %2665 = vmatprep.subr.bf16.mxu0 %v2664_v14  ;;  %2751 = vmatprep.subr.bf16.mxu1 %v2664_v14  ;;  %v645_v46 = vld [vmem:[%s3789_s19 + $0xd0] sm:$0xff]  ;;  %v646_v48 = vld [vmem:[%s3789_s19 + $0xd8] sm:$0xff]  ;;  %v647_v50 = vld [vmem:[%s3789_s19 + $0xe0] sm:$0xff] }
 0x125   : > { %v632_v51 = vld [vmem:[%s3789_s19 + $0x68] sm:$0xff]  ;;  %v633_v53 = vld [vmem:[%s3789_s19 + $0x70] sm:$0xff]  ;;  %v634_v55 = vld [vmem:[%s3789_s19 + $0x78] sm:$0xff] }
 0x126   : > { %v648_v52 = vld [vmem:[%s3789_s19 + $0xe8] sm:$0xff]  ;;  %v649_v54 = vld [vmem:[%s3789_s19 + $0xf0] sm:$0xff]  ;;  %v650_v56 = vld [vmem:[%s3789_s19 + $0xf8] sm:$0xff] }
 0x127   : > { %2667 = vmatpush3.bf16.msra.mxu0 %v2664_v14  ;;  %2759 = vmatpush3.bf16.msra.mxu1 %v2664_v14  ;;  %v1411_v57 = vld [vmem:[#allocation10] sm:$0xff]  ;;  %v1412_v58 = vld [vmem:[#allocation10 + $0x8] sm:$0xff]  ;;  %v1413_v60 = vld [vmem:[#allocation10 + $0x10] sm:$0xff] }
 0x128   : > { %2669 = vmatprep.subr.bf16.mxu0 %v2668_v17  ;;  %2752 = vmatprep.subr.bf16.mxu1 %v2668_v17  ;;  %v2684_v59 = vpack.c.bf16 %v1412_v58, %v1411_v57  ;;  %v1414_v61 = vld [vmem:[#allocation10 + $0x18] sm:$0xff]  ;;  %v1415_v63 = vld [vmem:[#allocation10 + $0x20] sm:$0xff]  ;;  %v1416_v0 = vld [vmem:[#allocation10 + $0x28] sm:$0xff] }
 0x129   : > { %v2688_v62 = vpack.c.bf16 %v1414_v61, %v1413_v60  ;;  %v2692_v1 = vpack.c.bf16 %v1416_v0, %v1415_v63  ;;  %v1417_v2 = vld [vmem:[#allocation10 + $0x30] sm:$0xff]  ;;  %v1418_v3 = vld [vmem:[#allocation10 + $0x38] sm:$0xff]  ;;  %v1419_v5 = vld [vmem:[#allocation10 + $0x40] sm:$0xff] }
 0x12a   : > { %v2696_v4 = vpack.c.bf16 %v1418_v3, %v1417_v2  ;;  %v1420_v6 = vld [vmem:[#allocation10 + $0x48] sm:$0xff]  ;;  %v1421_v8 = vld [vmem:[#allocation10 + $0x50] sm:$0xff]  ;;  %v1422_v9 = vld [vmem:[#allocation10 + $0x58] sm:$0xff] }
 0x12b   : > { %2671 = vmatpush3.bf16.msra.mxu0 %v2668_v17  ;;  %2760 = vmatpush3.bf16.msra.mxu1 %v2668_v17  ;;  %v2700_v7 = vpack.c.bf16 %v1420_v6, %v1419_v5  ;;  %v2704_v10 = vpack.c.bf16 %v1422_v9, %v1421_v8  ;;  %v1423_v11 = vld [vmem:[#allocation10 + $0x60] sm:$0xff]  ;;  %v1424_v12 = vld [vmem:[#allocation10 + $0x68] sm:$0xff]  ;;  %v1425_v14 = vld [vmem:[#allocation10 + $0x70] sm:$0xff] }
 0x12c   : > { %2673 = vmatprep.subr.bf16.mxu0 %v2672_v20  ;;  %2753 = vmatprep.subr.bf16.mxu1 %v2672_v20  ;;  %v2708_v13 = vpack.c.bf16 %v1424_v12, %v1423_v11  ;;  %v1426_v15 = vld [vmem:[#allocation10 + $0x78] sm:$0xff] }
 0x12d   : > { %v2712_v16 = vpack.c.bf16 %v1426_v15, %v1425_v14  ;;  %v3887_v17 = vld [vmem:[%s5210_s5] ss:$0 sm:$0xff] }
 0x12f   : > { %2675 = vmatpush3.bf16.msra.mxu0 %v2672_v20  ;;  %2761 = vmatpush3.bf16.msra.mxu1 %v2672_v20 }
 0x130   : > { %2677 = vmatprep.subr.bf16.mxu0 %v2676_v23  ;;  %2754 = vmatprep.subr.bf16.mxu1 %v2676_v23 }
 0x133   : > { %2679 = vmatpush3.bf16.msra.mxu0 %v2676_v23  ;;  %2762 = vmatpush3.bf16.msra.mxu1 %v2676_v23 }
 0x134   : > { %2681 = vmatprep.subr.bf16.mxu0 %v2680_v26  ;;  %2755 = vmatprep.subr.bf16.mxu1 %v2680_v26 }
 0x137   : > { %2683 = vmatpush3.bf16.msra.mxu0 %v2680_v26  ;;  %2763 = vmatpush3.bf16.msra.mxu1 %v2680_v26 }
 0x138   : > { %2685 = vmatprep.subr.bf16.mxu1 %v2684_v59 }
 0x13a   : > { %2525 = vmatmul.mubr.f32.vlgmr.msra.gmra.mrb[0].mxu0 %v620_v27  ;;  %2549 = vmatmul.mubr.f32.vlgmr.msra.gmra.mrb[0].mxu1 %v636_v28 }
 0x13b   : > { %2527 = vmatprep.mubr.f32.mxu0 %v621_v29  ;;  %2551 = vmatprep.mubr.f32.mxu1 %v637_v30 }
 0x13c   : > { %2687 = vmatpush3.bf16.msra.mxu1 %v2684_v59 }
 0x13d   : > { %2689 = vmatprep.subr.bf16.mxu1 %v2688_v62 }
 0x13e   : > { %2528 = vmatmul.mubr.f32.gmra.mrb[2].mxu0 %v622_v31  ;;  %2552 = vmatmul.mubr.f32.gmra.mrb[2].mxu1 %v638_v32 }
 0x13f   : > { %2530 = vmatprep.mubr.f32.mxu0 %v623_v33  ;;  %2554 = vmatprep.mubr.f32.mxu1 %v639_v34 }
 0x140   : > { %2691 = vmatpush3.bf16.msra.mxu1 %v2688_v62 }
 0x141   : > { %2693 = vmatprep.subr.bf16.mxu1 %v2692_v1 }
 0x142   : > { %2531 = vmatmul.mubr.f32.gmra.mrb[4].mxu0 %v624_v35  ;;  %2555 = vmatmul.mubr.f32.gmra.mrb[4].mxu1 %v640_v36 }
 0x143   : > { %2533 = vmatprep.mubr.f32.mxu0 %v625_v37  ;;  %2557 = vmatprep.mubr.f32.mxu1 %v641_v38 }
 0x144   : > { %2695 = vmatpush3.bf16.msra.mxu1 %v2692_v1 }
 0x145   : > { %2697 = vmatprep.subr.bf16.mxu1 %v2696_v4 }
 0x146   : > { %2534 = vmatmul.mubr.f32.gmra.mrb[6].mxu0 %v626_v39  ;;  %2558 = vmatmul.mubr.f32.gmra.mrb[6].mxu1 %v642_v40 }
 0x147   : > { %2536 = vmatprep.mubr.f32.mxu0 %v627_v41  ;;  %2560 = vmatprep.mubr.f32.mxu1 %v643_v42 }
 0x148   : > { %2699 = vmatpush3.bf16.msra.mxu1 %v2696_v4 }
 0x149   : > { %2701 = vmatprep.subr.bf16.mxu1 %v2700_v7 }
 0x14a   : > { %2537 = vmatmul.mubr.f32.gmra.mrb[8].mxu0 %v628_v43  ;;  %2561 = vmatmul.mubr.f32.gmra.mrb[8].mxu1 %v644_v44 }
 0x14b   : > { %2539 = vmatprep.mubr.f32.mxu0 %v629_v45  ;;  %2563 = vmatprep.mubr.f32.mxu1 %v645_v46 }
 0x14c   : > { %2703 = vmatpush3.bf16.msra.mxu1 %v2700_v7 }
 0x14d   : > { %2705 = vmatprep.subr.bf16.mxu1 %v2704_v10 }
 0x14e   : > { %2540 = vmatmul.mubr.f32.gmra.mrb[10].mxu0 %v630_v47  ;;  %2564 = vmatmul.mubr.f32.gmra.mrb[10].mxu1 %v646_v48 }
 0x14f   : > { %2542 = vmatprep.mubr.f32.mxu0 %v631_v49  ;;  %2566 = vmatprep.mubr.f32.mxu1 %v647_v50 }
 0x150   : > { %2707 = vmatpush3.bf16.msra.mxu1 %v2704_v10 }
 0x151   : > { %2709 = vmatprep.subr.bf16.mxu1 %v2708_v13 }
 0x152   : > { %2543 = vmatmul.mubr.f32.gmra.mrb[12].mxu0 %v632_v51  ;;  %2567 = vmatmul.mubr.f32.gmra.mrb[12].mxu1 %v648_v52 }
 0x153   : > { %2545 = vmatprep.mubr.f32.mxu0 %v633_v53  ;;  %2569 = vmatprep.mubr.f32.mxu1 %v649_v54 }
 0x154   : > { %2711 = vmatpush3.bf16.msra.mxu1 %v2708_v13 }
 0x155   : > { %2713 = vmatprep.subr.bf16.mxu1 %v2712_v16 }
 0x156   : > { %2546 = vmatmul.mubr.f32.gmra.mrb[14].mxu0 %v634_v55  ;;  %2570 = vmatmul.mubr.f32.gmra.mrb[14].mxu1 %v650_v56 }
 0x158   : > { %2715 = vmatpush3.bf16.msra.mxu1 %v2712_v16 }
 0x20d   : > { %v2526_v18 = vpop.f32.mrb[0].mxu0  ;;  %v2550_v19 = vpop.f32.mrb[0].mxu1 }
 0x20e   : > { %v3890_v20 = vadd.f32 %v2526_v18, %v3887_v17  ;;  %v3893_v21 = vadd.f32 %v2550_v19, %v3887_v17  ;;  %v740_v22 = vpop.f32.mrb[1].mxu0  ;;  %v820_v23 = vpop.f32.mrb[1].mxu1 }
 0x20f   : > { %v3896_v24 = vadd.f32 %v3887_v17, %v740_v22  ;;  %v3899_v25 = vadd.f32 %v3887_v17, %v820_v23 }
 0x210   : > { %5211 = vst [vmem:[#allocation37_spill] sm:$0xff] %v3893_v21  ;;  %v3902_v26 = vmul.f32 0.5, %v3890_v20  ;;  %v3905_v27 = vmul.f32 0.5, %v3893_v21 }
 0x211   : > { %5212 = vst [vmem:[#allocation38_spill] sm:$0xff] %v3899_v25  ;;  %v3908_v28 = vmul.f32 0.5, %v3896_v24  ;;  %v3911_v29 = vmul.f32 0.5, %v3899_v25  ;;  %v2529_v30 = vpop.f32.mrb[2].mxu0  ;;  %v2553_v31 = vpop.f32.mrb[2].mxu1 }
 0x212   : > { %5213 = vst [vmem:[#allocation39_spill] sm:$0xff] %v3905_v27  ;;  %v964_v32 = vmin.f32 %v3902_v26, 14.0  ;;  %v980_v33 = vmin.f32 %v3905_v27, 14.0  ;;  %v3916_v34 = vadd.f32 %v2529_v30, %v3887_v17  ;;  %v750_v35 = vpop.f32.mrb[3].mxu0  ;;  %v830_v36 = vpop.f32.mrb[3].mxu1  ;;  %v3921_v39 = vadd.f32 %v2553_v31, %v3887_v17 }
 0x213   : > { %v963_v37 = vmin.f32 %v3908_v28, 14.0  ;;  %v979_v38 = vmin.f32 %v3911_v29, 14.0  ;;  %v3924_v40 = vadd.f32 %v3887_v17, %v750_v35  ;;  %v3930_v43 = vadd.f32 %v3887_v17, %v830_v36 }
 0x214   : > { %5214 = vst [vmem:[#allocation40_spill] sm:$0xff] %v3921_v39  ;;  %v997_v41 = vmul.f32 1.442695, %v964_v32  ;;  %v3927_v42 = vmul.f32 0.5, %v3916_v34  ;;  %v1029_v44 = vmul.f32 1.442695, %v980_v33 }
 0x215   : > { %5215 = vst [vmem:[#allocation41_spill] sm:$0xff] %v3930_v43  ;;  %v3933_v45 = vmul.f32 0.5, %v3921_v39  ;;  %v3936_v46 = vmul.f32 0.5, %v3924_v40  ;;  %v995_v47 = vmul.f32 1.442695, %v963_v37  ;;  %v3940_v49 = vmul.f32 0.5, %v3930_v43 }
 0x216   : > { %2939 = vpow2.f32 %v997_v41  ;;  %v966_v48 = vmin.f32 %v3927_v42, 14.0  ;;  %v2532_v50 = vpop.f32.mrb[4].mxu0  ;;  %v2556_v51 = vpop.f32.mrb[4].mxu1  ;;  %v1027_v52 = vmul.f32 1.442695, %v979_v38  ;;  %vm932_vm1 = vcmp.gt.f32.partialorder %v3902_v26, 14.0 }
 0x217   : > { %5216 = vst [vmem:[#allocation42_spill] sm:$0xff] %v3933_v45  ;;  %5217 = vst [vmem:[#allocation43_spill] sm:$0xff] %v3940_v49  ;;  %v982_v53 = vmin.f32 %v3933_v45, 14.0  ;;  %v3944_v54 = vadd.f32 %v2532_v50, %v3887_v17  ;;  %v760_v55 = vpop.f32.mrb[5].mxu0  ;;  %v840_v56 = vpop.f32.mrb[5].mxu1  ;;  %v965_v57 = vmin.f32 %v3936_v46, 14.0  ;;  %v3948_v58 = vadd.f32 %v2556_v51, %v3887_v17 }
 0x218   : > { %2941 = vpow2.f32 %v1029_v44  ;;  %v1001_v59 = vmul.f32 1.442695, %v966_v48  ;;  %v981_v60 = vmin.f32 %v3940_v49, 14.0  ;;  %v3958_v1 = vadd.f32 %v3887_v17, %v760_v55 }
 0x219   : > { %5218 = vst [vmem:[#allocation44_spill] sm:$0xff] %v3948_v58  ;;  %v3952_v61 = vmul.f32 0.5, %v3944_v54  ;;  %v2535_v62 = vpop.f32.mrb[6].mxu0  ;;  %2943 = vpow2.f32 %v995_v47  ;;  %v1033_v63 = vmul.f32 1.442695, %v982_v53  ;;  %v3955_v0 = vmul.f32 0.5, %v3948_v58 }
 0x21a   : > { %v2559_v2 = vpop.f32.mrb[6].mxu1  ;;  %v770_v3 = vpop.f32.mrb[7].mxu0  ;;  %2945 = vpow2.f32 %v1027_v52  ;;  %v3962_v5 = vadd.f32 %v3887_v17, %v840_v56  ;;  %v3965_v6 = vadd.f32 %v2535_v62, %v3887_v17  ;;  %v999_v8 = vmul.f32 1.442695, %v965_v57 }
 0x21b   : > { %5219 = vst [vmem:[#allocation45_spill] sm:$0xff] %v3955_v0  ;;  %v968_v4 = vmin.f32 %v3952_v61, 14.0  ;;  %v850_v7 = vpop.f32.mrb[7].mxu1  ;;  %v984_v9 = vmin.f32 %v3955_v0, 14.0  ;;  %v3969_v10 = vmul.f32 0.5, %v3958_v1  ;;  %v3972_v11 = vadd.f32 %v2559_v2, %v3887_v17 }
 0x21c   : > { %5220 = vst [vmem:[#allocation46_spill] sm:$0xff] %v3962_v5  ;;  %2947 = vpow2.f32 %v1001_v59  ;;  %v1031_v12 = vmul.f32 1.442695, %v981_v60  ;;  %v3975_v13 = vmul.f32 0.5, %v3962_v5  ;;  %v3978_v18 = vadd.f32 %v3887_v17, %v770_v3 }
 0x21d   : > { %5221 = vst [vmem:[#allocation47_spill] sm:$0xff] %v3972_v11  ;;  %v2538_v14 = vpop.f32.mrb[8].mxu0  ;;  %v2562_v15 = vpop.f32.mrb[8].mxu1  ;;  %2949 = vpow2.f32 %v1033_v63  ;;  %v1005_v16 = vmul.f32 1.442695, %v968_v4  ;;  %v967_v30 = vmin.f32 %v3969_v10, 14.0  ;;  %v3985_v32 = vadd.f32 %v3887_v17, %v850_v7 }
 0x21e   : > { %5222 = vst [vmem:[#allocation48_spill] sm:$0xff] %v3975_v13  ;;  %v780_v19 = vpop.f32.mrb[9].mxu0  ;;  %v860_v22 = vpop.f32.mrb[9].mxu1  ;;  %v1037_v23 = vmul.f32 1.442695, %v984_v9  ;;  %v3982_v31 = vmul.f32 0.5, %v3965_v6  ;;  %2951 = vpow2.f32 %v999_v8  ;;  %v4007_v56 = vadd.f32 %v2538_v14, %v3887_v17 }
 0x21f   : > { %5223 = vst [vmem:[#allocation49_spill] sm:$0xff] %v3985_v32  ;;  %v3990_v35 = vmul.f32 0.5, %v3972_v11  ;;  %2953 = vpow2.f32 %v1031_v12  ;;  %v983_v37 = vmin.f32 %v3975_v13, 14.0  ;;  %v3995_v38 = vmul.f32 0.5, %v3978_v18 }
 0x220   : > { %v3987_v33 = vpop.eup %2939  ;;  %2955 = vpow2.f32 %v1005_v16  ;;  %v1003_v47 = vmul.f32 1.442695, %v967_v30  ;;  %v970_v48 = vmin.f32 %v3982_v31, 14.0  ;;  %v4001_v50 = vmul.f32 0.5, %v3985_v32 }
 0x221   : > { %5224 = vst [vmem:[#allocation50_spill] sm:$0xff] %v3990_v35  ;;  %v1068_v36 = vadd.f32 1.0, %v3987_v33  ;;  %v2541_v41 = vpop.f32.mrb[10].mxu0  ;;  %2957 = vpow2.f32 %v1037_v23  ;;  %v2565_v51 = vpop.f32.mrb[10].mxu1  ;;  %v986_v55 = vmin.f32 %v3990_v35, 14.0  ;;  %v4010_v57 = vadd.f32 %v2562_v15, %v3887_v17 }
 0x222   : > { %v3997_v44 = vpop.eup %2941  ;;  %5225 = vst [vmem:[#allocation51_spill] sm:$0xff] %v4001_v50  ;;  %v790_v52 = vpop.f32.mrb[11].mxu0  ;;  %v1071_v62 = vmul.f32 -0.5, %v3987_v33  ;;  %v1035_v63 = vmul.f32 1.442695, %v983_v37  ;;  %v969_v2 = vmin.f32 %v3995_v38, 14.0  ;;  %v4017_v3 = vadd.f32 %v3887_v17, %v780_v19 }
 0x223   : > { %v4003_v53 = vpop.eup %2943  ;;  %2959 = vlog2.f32 %v1068_v36  ;;  %5226 = vst [vmem:[#allocation52_spill] sm:$0xff] %v4010_v57  ;;  %v870_v59 = vpop.f32.mrb[11].mxu1  ;;  %v985_v8 = vmin.f32 %v4001_v50, 14.0  ;;  %v4021_v9 = vmul.f32 0.5, %v4007_v56  ;;  %v4024_v12 = vmul.f32 0.5, %v4010_v57 }
 0x224   : > { %v4012_v60 = vpop.eup %2945  ;;  %v4027_v14 = vadd.f32 %v3887_v17, %v860_v22  ;;  %2961 = vpow2.f32 %v1003_v47  ;;  %v1009_v19 = vmul.f32 1.442695, %v970_v48  ;;  %v4032_v30 = vmul.f32 0.5, %v4017_v3 }
 0x225   : > { %v2544_v4 = vpop.f32.mrb[12].mxu0  ;;  %v2568_v7 = vpop.f32.mrb[12].mxu1  ;;  %5227 = vst [vmem:[#allocation53_spill] sm:$0xff] %v4024_v12  ;;  %v4035_v36 = vadd.f32 %v2541_v41, %v3887_v17  ;;  %v1041_v11 = vmul.f32 1.442695, %v986_v55  ;;  %v972_v57 = vmin.f32 %v4021_v9, 14.0  ;;  %v4044_v32 = vadd.f32 %v2565_v51, %v3887_v17 }
 0x226   : > { %5228 = vst [vmem:[#allocation54_spill] sm:$0xff] %v4027_v14  ;;  %v800_v15 = vpop.f32.mrb[13].mxu0  ;;  %v880_v16 = vpop.f32.mrb[13].mxu1  ;;  %v4041_v22 = vmul.f32 0.5, %v4027_v14  ;;  %v1007_v35 = vmul.f32 1.442695, %v969_v2  ;;  %v4051_v41 = vadd.f32 %v3887_v17, %v790_v52  ;;  %2963 = vpow2.f32 %v1035_v63 }
 0x227   : > { %v4029_v23 = vpop.eup %2947  ;;  %5231 = vst [vmem:[#allocation57_spill] sm:$0xff] %v4044_v32  ;;  %v988_v47 = vmin.f32 %v4024_v12, 14.0  ;;  %v4048_v48 = vmul.f32 0.5, %v4035_v36  ;;  %v1072_v5 = vadd.f32 1.0, %v1071_v62  ;;  %v1039_v14 = vmul.f32 1.442695, %v985_v8 }
 0x228   : > { %v4037_v37 = vpop.eup %2949  ;;  %5230 = vst [vmem:[#allocation56_spill] sm:$0xff] %v4041_v22  ;;  %v971_v39 = vmin.f32 %v4032_v30, 14.0  ;;  %2965 = vpow2.f32 %v1009_v19  ;;  %v987_v2 = vmin.f32 %v4041_v22, 14.0  ;;  %v4060_v12 = vmul.f32 0.5, %v4044_v32 }
 0x229   : > { %5229 = vst [vmem:[#allocation55_spill] sm:$0xff] %v4037_v37  ;;  %v2547_v58 = vpop.f32.mrb[14].mxu0  ;;  %v2571_v50 = vpop.f32.mrb[14].mxu1  ;;  %v4063_v52 = vadd.f32 %v3887_v17, %v870_v59  ;;  %2967 = vpow2.f32 %v1041_v11  ;;  %v1013_v62 = vmul.f32 1.442695, %v972_v57  ;;  %v4068_v63 = vmul.f32 0.5, %v4051_v41 }
 0x22a   : > { %v4053_v55 = vpop.eup %2951  ;;  %5232 = vst [vmem:[#allocation58_spill] sm:$0xff] %v4060_v12  ;;  %v810_v0 = vpop.f32.mrb[15].mxu0  ;;  %v4071_v8 = vadd.f32 %v2544_v4, %v3887_v17  ;;  %2969 = vpow2.f32 %v1007_v35  ;;  %v1045_v32 = vmul.f32 1.442695, %v988_v47  ;;  %v974_v22 = vmin.f32 %v4048_v48, 14.0 }
 0x22b   : > { %v4056_v51 = vpop.eup %2953  ;;  %5233 = vst [vmem:[#allocation59_spill] sm:$0xff] %v4063_v52  ;;  %v890_v13 = vpop.f32.mrb[15].mxu1  ;;  %v1074_v21 = vand.u32 2147483647, %v3987_v33  ;;  %2971 = vpow2.f32 %v1039_v14  ;;  %v1011_v45 = vmul.f32 1.442695, %v971_v39  ;;  %v4085_v25 = vadd.f32 %v2568_v7, %v3887_v17 }
 0x22c   : > { %v4065_v43 = vpop.eup %2955  ;;  %5234 = vst [vmem:[#allocation60_spill] sm:$0xff] %v4071_v8  ;;  %v4078_v11 = vmul.f32 0.5, %v4063_v52  ;;  %v1043_v57 = vmul.f32 1.442695, %v987_v2  ;;  %v990_v49 = vmin.f32 %v4060_v12, 14.0  ;;  %v4082_v4 = vmul.f32 0.5, %v4071_v8 }
 0x22d   : > { %v4073_v19 = vpop.eup %2957  ;;  %5237 = vst [vmem:[#allocation63_spill] sm:$0xff] %v4085_v25  ;;  %v1073_v35 = vmul.f32 %v3987_v33, %v1072_v5  ;;  %2973 = vpow2.f32 %v1013_v62  ;;  %v973_v47 = vmin.f32 %v4068_v63, 14.0  ;;  %v4090_v14 = vadd.f32 %v3887_v17, %v800_v15 }
 0x22e   : > { %5235 = vst [vmem:[#allocation61_spill] sm:$0xff] %v4073_v19  ;;  %v2960_v59 = vpop.eup %2959  ;;  %5236 = vst [vmem:[#allocation62_spill] sm:$0xff] %v4078_v11  ;;  %2975 = vpow2.f32 %v1045_v32  ;;  %v1017_v2 = vmul.f32 1.442695, %v974_v22  ;;  %v4095_v12 = vmul.f32 0.5, %v4085_v25  ;;  %v989_v7 = vmin.f32 %v4078_v11, 14.0 }
 0x22f   : > { %5238 = vst [vmem:[#allocation64_spill] sm:$0xff] %v4090_v14  ;;  %v4092_v39 = vpop.eup %2961  ;;  %v1070_v52 = vmul.f32 0.6931472, %v2960_v59  ;;  %2977 = vpow2.f32 %v1011_v45  ;;  %v4099_v19 = vmul.f32 0.5, %v4090_v14  ;;  %v4102_v5 = vadd.f32 %v3887_v17, %v880_v16 }
 0x230   : > { %5239 = vst [vmem:[#allocation65_spill] sm:$0xff] %v4095_v12  ;;  %2979 = vpow2.f32 %v1043_v57  ;;  %v1049_v33 = vmul.f32 1.442695, %v990_v49  ;;  %v976_v15 = vmin.f32 %v4082_v4, 14.0  ;;  %v4106_v62 = vadd.f32 %v2547_v58, %v3887_v17  ;;  %v4108_v32 = vpop.eup %2963 }
 0x231   : > { %5240 = vst [vmem:[#allocation66_spill] sm:$0xff] %v4102_v5  ;;  %5242 = vst [vmem:[#allocation68_spill] sm:$0xff] %v4108_v32  ;;  %v1015_v22 = vmul.f32 1.442695, %v973_v47  ;;  %v992_v45 = vmin.f32 %v4095_v12, 14.0  ;;  %v4112_v59 = vmul.f32 0.5, %v4102_v5  ;;  %v4115_v25 = vadd.f32 %v2571_v50, %v3887_v17 }
 0x232   : > { %5241 = vst [vmem:[#allocation67_spill] sm:$0xff] %v4106_v62  ;;  %v4117_v16 = vpop.eup %2965  ;;  %v975_v49 = vmin.f32 %v4099_v19, 14.0  ;;  %v4121_v57 = vmul.f32 0.5, %v4106_v62  ;;  %v4124_v58 = vadd.f32 %v3887_v17, %v810_v0  ;;  %v4127_v47 = vadd.f32 %v3887_v17, %v890_v13 }
 0x233   : > { %5243 = vst [vmem:[#allocation69_spill] sm:$0xff] %v4112_v59  ;;  %5244 = vst [vmem:[#allocation70_spill] sm:$0xff] %v4115_v25  ;;  %v4129_v12 = vpop.eup %2967  ;;  %2981 = vpow2.f32 %v1017_v2  ;;  %v1047_v5 = vmul.f32 1.442695, %v989_v7  ;;  %v991_v50 = vmin.f32 %v4112_v59, 14.0  ;;  %v1059_v11 = vadd.f32 1.0, %v4003_v53 }
 0x234   : > { %5245 = vst [vmem:[#allocation71_spill] sm:$0xff] %v4124_v58  ;;  %5246 = vst [vmem:[#allocation72_spill] sm:$0xff] %v4127_v47  ;;  %v4133_v27 = vpop.eup %2969  ;;  %vm4135_vm0 = vcmp.lt.f32.partialorder %v1074_v21, 0.0004427343  ;;  %2983 = vpow2.f32 %v1049_v33  ;;  %v1021_v0 = vmul.f32 1.442695, %v976_v15 }
 0x235   : > { %5247 = vst [vmem:[#allocation73_spill] sm:$0xff] %v4129_v12  ;;  %v4139_v62 = vpop.eup %2971  ;;  %v1076_v17 = vsel %vm4135_vm0, %v1073_v35, %v1070_v52  ;;  %2985 = vpow2.f32 %v1015_v22  ;;  %v1053_v13 = vmul.f32 1.442695, %v992_v45  ;;  %v1019_v2 = vmul.f32 1.442695, %v975_v49 }
 0x236   : > { %5250 = vst [vmem:[#allocation74_spill] sm:$0xff] %v4139_v62  ;;  %v978_v7 = vmin.f32 %v4121_v57, 14.0  ;;  %v4145_v59 = vmul.f32 0.5, %v4124_v58  ;;  %2987 = vlog2.f32 %v1059_v11  ;;  %v1051_v12 = vmul.f32 1.442695, %v991_v50 }
 0x237   : > { %v4147_v21 = vpop.eup %2973  ;;  %2989 = vpow2.f32 %v1047_v5  ;;  %v4150_v33 = vmul.f32 0.5, %v4115_v25  ;;  %v4155_v52 = vmul.f32 0.5, %v4127_v47  ;;  %v1062_v35 = vmul.f32 -0.5, %v4003_v53 }
 0x238   : > { %v4152_v15 = vpop.eup %2975  ;;  %2991 = vpow2.f32 %v1021_v0  ;;  %v1348_v22 = vmul.f32 2.0, %v1076_v17  ;;  %v1077_v11 = vadd.f32 1.0, %v4053_v55  ;;  %v1025_v5 = vmul.f32 1.442695, %v978_v7 }
 0x239   : > { %5251 = vst [vmem:[#allocation75_spill] sm:$0xff] %v4150_v33  ;;  %5252 = vst [vmem:[#allocation76_spill] sm:$0xff] %v4152_v15  ;;  %v4158_v32 = vpop.eup %2977  ;;  %2993 = vpow2.f32 %v1053_v13  ;;  %v977_v49 = vmin.f32 %v4145_v59, 14.0  ;;  %v994_v50 = vmin.f32 %v4150_v33, 14.0  ;;  %v1086_v0 = vadd.f32 1.0, %v4029_v23 }
 0x23a   : > { %5253 = vst [vmem:[#allocation77_spill] sm:$0xff] %v4155_v52  ;;  %v4161_v45 = vpop.eup %2979  ;;  %2995 = vpow2.f32 %v1019_v2  ;;  %v993_v25 = vmin.f32 %v4155_v52, 14.0  ;;  %v1063_v47 = vadd.f32 1.0, %v1062_v35  ;;  %v1380_v13 = vsel %vm932_vm1, %v3890_v20, %v1348_v22 }
 0x23b   : > { %5254 = vst [vmem:[#allocation78_spill] sm:$0xff] %v4161_v45  ;;  %2997 = vpow2.f32 %v1051_v12  ;;  %vm931_vm2 = vcmp.gt.f32.partialorder %v3908_v28, 14.0  ;;  %v1080_v2 = vmul.f32 -0.5, %v4053_v55  ;;  %v1095_v12 = vadd.f32 1.0, %v4092_v39 }
 0x23c   : > { %2999 = vlog2.f32 %v1077_v11  ;;  %v1023_v33 = vmul.f32 1.442695, %v977_v49  ;;  %v1065_v26 = vand.u32 2147483647, %v4003_v53  ;;  %v1089_v35 = vmul.f32 -0.5, %v4029_v23 }
 0x23d   : > { %v4168_v17 = vpop.eup %2981  ;;  %3001 = vlog2.f32 %v1086_v0  ;;  %v4180_v52 = vmul.f32 1.442695, %v994_v50  ;;  %v1083_v20 = vand.u32 2147483647, %v4053_v55  ;;  %v1104_v22 = vadd.f32 1.0, %v4065_v43 }
 0x23e   : > { %v4174_v7 = vpop.eup %2983  ;;  %3003 = vpow2.f32 %v1025_v5  ;;  %v4184_v15 = vmul.f32 1.442695, %v993_v25  ;;  %v1092_v5 = vand.u32 2147483647, %v4029_v23  ;;  %v1098_v49 = vmul.f32 -0.5, %v4092_v39 }
 0x23f   : > { %5255 = vst [vmem:[#allocation79_spill] sm:$0xff] %v4174_v7  ;;  %v4178_v11 = vpop.eup %2985  ;;  %3005 = vlog2.f32 %v1095_v12  ;;  %v1064_v7 = vmul.f32 %v4003_v53, %v1063_v47  ;;  %v1081_v58 = vadd.f32 1.0, %v1080_v2  ;;  %v1113_v50 = vadd.f32 1.0, %v4133_v27 }
 0x240   : > { %v2988_v0 = vpop.eup %2987  ;;  %5256 = vst [vmem:[#allocation80_spill] sm:$0xff] %v4184_v15  ;;  %3007 = vlog2.f32 %v1104_v22  ;;  %vm1066_vm3 = vcmp.lt.f32.partialorder %v1065_v26, 0.0004427343  ;;  %v1090_v12 = vadd.f32 1.0, %v1089_v35  ;;  %v1107_v25 = vmul.f32 -0.5, %v4065_v43 }
 0x241   : > { %v4189_v45 = vpop.eup %2989  ;;  %v1061_v62 = vmul.f32 0.6931472, %v2988_v0  ;;  %3009 = vpow2.f32 %v1023_v33  ;;  %vm933_vm4 = vcmp.gt.f32.partialorder %v3936_v46, 14.0  ;;  %vm4198_vm5 = vcmp.lt.f32.partialorder %v1083_v20, 0.0004427343 }
 0x242   : > { %5257 = vst [vmem:[#allocation81_spill] sm:$0xff] %v4189_v45  ;;  %v4192_v8 = vpop.eup %2991  ;;  %v1101_v2 = vand.u32 2147483647, %v4092_v39  ;;  %3011 = vlog2.f32 %v1113_v50  ;;  %vm934_vm6 = vcmp.gt.f32.partialorder %v3927_v42, 14.0  ;;  %v1099_v33 = vadd.f32 1.0, %v1098_v49 }
 0x243   : > { %v4195_v15 = vpop.eup %2993  ;;  %v1067_v53 = vsel %vm1066_vm3, %v1064_v7, %v1061_v62  ;;  %v1110_v26 = vand.u32 2147483647, %v4065_v43  ;;  %v1122_v35 = vadd.f32 1.0, %v4117_v16  ;;  %v1082_v7 = vmul.f32 %v4053_v55, %v1081_v58 }
 0x244   : > { %5258 = vst [vmem:[#allocation82_spill] sm:$0xff] %v4195_v15  ;;  %v4203_v22 = vpop.eup %2995  ;;  %v1347_v0 = vmul.f32 2.0, %v1067_v53  ;;  %vm4211_vm7 = vcmp.lt.f32.partialorder %v1092_v5, 0.0004427343  ;;  %v1116_v50 = vmul.f32 -0.5, %v4133_v27  ;;  %v1131_v15 = vadd.f32 1.0, %v4158_v32 }
 0x245   : > { %v4208_v62 = vpop.eup %2997  ;;  %v1091_v45 = vmul.f32 %v4029_v23, %v1090_v12  ;;  %vm935_vm8 = vcmp.gt.f32.partialorder %v3969_v10, 14.0  ;;  %3013 = vlog2.f32 %v1122_v35  ;;  %vm4222_vm9 = vcmp.lt.f32.partialorder %v1101_v2, 0.0004427343 }
 0x246   : > { %5261 = vst [vmem:[#allocation83_spill] sm:$0xff] %v4208_v62  ;;  %v3000_v53 = vpop.eup %2999  ;;  %v1379_v49 = vsel %vm931_vm2, %v3896_v24, %v1347_v0  ;;  %v1108_v62 = vadd.f32 1.0, %v1107_v25  ;;  %v1119_v37 = vand.u32 2147483647, %v4133_v27  ;;  %3015 = vlog2.f32 %v1131_v15 }
 0x247   : > { %v3002_v55 = vpop.eup %3001  ;;  %2604 = vmatprep.mubr.f32.mxu1 %v1379_v49  ;;  %v1079_v58 = vmul.f32 0.6931472, %v3000_v53  ;;  %v1100_v28 = vmul.f32 %v4092_v39, %v1099_v33  ;;  %vm936_vm10 = vcmp.gt.f32.partialorder %v3952_v61, 14.0  ;;  %vm4231_vm11 = vcmp.lt.f32.partialorder %v1110_v26, 0.0004427343 }
 0x248   : > { %v4227_v14 = vpop.eup %3003  ;;  %2605 = vmatmul.mubr.f32.vlgmr.msra.gmra.mrb[16].mxu1 %v1380_v13  ;;  %v1088_v24 = vmul.f32 0.6931472, %v3002_v55  ;;  %v1125_v12 = vmul.f32 -0.5, %v4117_v16  ;;  %v1117_v0 = vadd.f32 1.0, %v1116_v50  ;;  %v1134_v15 = vmul.f32 -0.5, %v4158_v32 }
 0x249   : > { %v3006_v25 = vpop.eup %3005  ;;  %v1085_v2 = vsel %vm4198_vm5, %v1082_v7, %v1079_v58  ;;  %v1140_v13 = vadd.f32 1.0, %v4147_v21  ;;  %v1109_v26 = vmul.f32 %v4065_v43, %v1108_v62  ;;  %vm937_vm12 = vcmp.gt.f32.partialorder %v3995_v38, 14.0 }
 0x24a   : > { %v1349_v35 = vmul.f32 2.0, %v1085_v2  ;;  %v1094_v39 = vsel %vm4211_vm7, %v1091_v45, %v1088_v24  ;;  %v1097_v33 = vmul.f32 0.6931472, %v3006_v25  ;;  %v3008_v53 = vpop.eup %3007  ;;  %vm4244_vm13 = vcmp.lt.f32.partialorder %v1119_v37, 0.0004427343 }
 0x24b   : > { %v1350_v49 = vmul.f32 2.0, %v1094_v39  ;;  %v1128_v47 = vand.u32 2147483647, %v4117_v16  ;;  %3017 = vlog2.f32 %v1140_v13  ;;  %v4249_v7 = vpop.eup %3009  ;;  %v1106_v62 = vmul.f32 0.6931472, %v3008_v53 }
 0x24c   : > { %v1381_v45 = vsel %vm933_vm4, %v3924_v40, %v1349_v35  ;;  %v1103_v43 = vsel %vm4222_vm9, %v1100_v28, %v1097_v33  ;;  %v1126_v20 = vadd.f32 1.0, %v1125_v12  ;;  %v3012_v50 = vpop.eup %3011  ;;  %v1118_v24 = vmul.f32 %v4133_v27, %v1117_v0 }
 0x24d   : > { %2607 = vmatprep.mubr.f32.mxu1 %v1381_v45  ;;  %v1382_v37 = vsel %vm934_vm6, %v3916_v34, %v1350_v49  ;;  %v1351_v58 = vmul.f32 2.0, %v1103_v43  ;;  %v1135_v25 = vadd.f32 1.0, %v1134_v15  ;;  %v1112_v46 = vsel %vm4231_vm11, %v1109_v26, %v1106_v62 }
 0x24e   : > { %2608 = vmatmul.mubr.f32.gmra.mrb[18].mxu1 %v1382_v37  ;;  %v1115_v40 = vmul.f32 0.6931472, %v3012_v50  ;;  %v1143_v5 = vmul.f32 -0.5, %v4147_v21  ;;  %v1149_v28 = vadd.f32 1.0, %v4178_v11  ;;  %v1352_v2 = vmul.f32 2.0, %v1112_v46 }
 0x24f   : > { %v1383_v12 = vsel %vm935_vm8, %v3958_v1, %v1351_v58  ;;  %vm4267_vm14 = vcmp.lt.f32.partialorder %v1128_v47, 0.0004427343  ;;  %v1137_v27 = vand.u32 2147483647, %v4158_v32  ;;  %v3014_v42 = vpop.eup %3013  ;;  %v1127_v0 = vmul.f32 %v4117_v16, %v1126_v20 }
 0x250   : > { %2610 = vmatprep.mubr.f32.mxu1 %v1383_v12  ;;  %v1121_v23 = vsel %vm4244_vm13, %v1118_v24, %v1115_v40  ;;  %3019 = vlog2.f32 %v1149_v28  ;;  %v1158_v15 = vadd.f32 1.0, %v4168_v17  ;;  %v3016_v13 = vpop.eup %3015  ;;  %v1384_v1 = vsel %vm936_vm10, %v3944_v54, %v1352_v2 }
 0x251   : > { %v1353_v10 = vmul.f32 2.0, %v1121_v23  ;;  %v1124_v35 = vmul.f32 0.6931472, %v3014_v42  ;;  %v1136_v39 = vmul.f32 %v4158_v32, %v1135_v25  ;;  %v1133_v33 = vmul.f32 0.6931472, %v3016_v13 }
 0x252   : > { %2611 = vmatmul.mubr.f32.gmra.mrb[20].mxu1 %v1384_v1  ;;  %v1144_v26 = vadd.f32 1.0, %v1143_v5  ;;  %v1146_v53 = vand.u32 2147483647, %v4147_v21  ;;  %3021 = vlog2.f32 %v1158_v15  ;;  %vm1138_vm15 = vcmp.lt.f32.partialorder %v1137_v27, 0.0004427343 }
 0x253   : > { %v1385_v16 = vsel %vm937_vm12, %v3978_v18, %v1353_v10  ;;  %v1130_v49 = vsel %vm4267_vm14, %v1127_v0, %v1124_v35  ;;  %v1152_v54 = vmul.f32 -0.5, %v4178_v11  ;;  %3023 = vpow2.f32 %v4180_v52 }
 0x254   : > { %2613 = vmatprep.mubr.f32.mxu1 %v1385_v16  ;;  %v1354_v61 = vmul.f32 2.0, %v1130_v49  ;;  %v1139_v32 = vsel %vm1138_vm15, %v1136_v39, %v1133_v33  ;;  %v1161_v55 = vmul.f32 -0.5, %v4168_v17  ;;  %vm938_vm0 = vcmp.gt.f32.partialorder %v3982_v31, 14.0 }
 0x255   : > { %v3018_v47 = vpop.eup %3017  ;;  %vm939_vm1 = vcmp.gt.f32.partialorder %v4032_v30, 14.0  ;;  %v1355_v38 = vmul.f32 2.0, %v1139_v32  ;;  %v1167_v18 = vadd.f32 1.0, %v4203_v22  ;;  %v1145_v62 = vmul.f32 %v4147_v21, %v1144_v26 }
 0x256   : > { %v1386_v45 = vsel %vm938_vm0, %v3965_v6, %v1354_v61  ;;  %v1142_v43 = vmul.f32 0.6931472, %v3018_v47  ;;  %vm1147_vm2 = vcmp.lt.f32.partialorder %v1146_v53, 0.0004427343  ;;  %v1153_v20 = vadd.f32 1.0, %v1152_v54 }
 0x257   : > { %2614 = vmatmul.mubr.f32.gmra.mrb[22].mxu1 %v1386_v45  ;;  %v1387_v52 = vsel %vm939_vm1, %v4017_v3, %v1355_v38  ;;  %v1155_v50 = vand.u32 2147483647, %v4178_v11  ;;  %3025 = vlog2.f32 %v1167_v18  ;;  %v1162_v37 = vadd.f32 1.0, %v1161_v55  ;;  %v5296_v55 = vld [vmem:[#allocation38_spill] sm:$0xff] }
 0x258   : > { %2616 = vmatprep.mubr.f32.mxu1 %v1387_v52  ;;  %v1148_v31 = vsel %vm1147_vm2, %v1145_v62, %v1142_v43  ;;  %v1164_v30 = vand.u32 2147483647, %v4168_v17  ;;  %v1176_v58 = vadd.f32 1.0, %v4192_v8  ;;  %vm940_vm3 = vcmp.gt.f32.partialorder %v4021_v9, 14.0 }
 0x259   : > { %v1356_v6 = vmul.f32 2.0, %v1148_v31  ;;  %vm941_vm4 = vcmp.gt.f32.partialorder %v4068_v63, 14.0  ;;  %v1170_v21 = vmul.f32 -0.5, %v4203_v22  ;;  %vm942_vm5 = vcmp.gt.f32.partialorder %v4048_v48, 14.0  ;;  %v5280_v31 = vld [vmem:[#allocation64_spill] sm:$0xff] }
 0x25a   : > { %v3020_v24 = vpop.eup %3019  ;;  %3027 = vlog2.f32 %v1176_v58  ;;  %v1179_v3 = vmul.f32 -0.5, %v4192_v8  ;;  %v1185_v25 = vadd.f32 1.0, %v4249_v7  ;;  %v1154_v5 = vmul.f32 %v4178_v11, %v1153_v20 }
 0x25b   : > { %v1388_v46 = vsel %vm940_vm3, %v4007_v56, %v1356_v6  ;;  %v1151_v40 = vmul.f32 0.6931472, %v3020_v24  ;;  %vm1156_vm6 = vcmp.lt.f32.partialorder %v1155_v50, 0.0004427343  ;;  %v1163_v28 = vmul.f32 %v4168_v17, %v1162_v37 }
 0x25c   : > { %v3022_v9 = vpop.eup %3021  ;;  %2617 = vmatmul.mubr.f32.gmra.mrb[24].mxu1 %v1388_v46  ;;  %vm4307_vm7 = vcmp.lt.f32.partialorder %v1164_v30, 0.0004427343  ;;  %v1173_v2 = vand.u32 2147483647, %v4203_v22  ;;  %3029 = vlog2.f32 %v1185_v25  ;;  %v1171_v42 = vadd.f32 1.0, %v1170_v21 }
 0x25d   : > { %v1157_v34 = vsel %vm1156_vm6, %v1154_v5, %v1151_v40  ;;  %v1160_v27 = vmul.f32 0.6931472, %v3022_v9  ;;  %v1194_v56 = vadd.f32 1.0, %v4227_v14  ;;  %v4313_v23 = vpop.eup %3023  ;;  %v1180_v0 = vadd.f32 1.0, %v1179_v3  ;;  %v5283_v5 = vld [vmem:[#allocation55_spill] sm:$0xff] }
 0x25e   : > { %v1357_v11 = vmul.f32 2.0, %v1157_v34  ;;  %v1182_v15 = vand.u32 2147483647, %v4192_v8  ;;  %v1188_v17 = vmul.f32 -0.5, %v4249_v7  ;;  %v1191_v1 = vand.u32 2147483647, %v4249_v7 }
 0x25f   : > { %v1166_v13 = vsel %vm4307_vm7, %v1163_v28, %v1160_v27  ;;  %3031 = vlog2.f32 %v1194_v56  ;;  %v1203_v10 = vadd.f32 1.0, %v4012_v60  ;;  %vm943_vm8 = vcmp.gt.f32.partialorder %v4099_v19, 14.0  ;;  %v5284_v28 = vld [vmem:[#allocation60_spill] sm:$0xff] }
 0x260   : > { %v1389_v35 = vsel %vm941_vm4, %v4051_v41, %v1357_v11  ;;  %v1358_v39 = vmul.f32 2.0, %v1166_v13  ;;  %v1197_v33 = vmul.f32 -0.5, %v4227_v14  ;;  %v1172_v53 = vmul.f32 %v4203_v22, %v1171_v42  ;;  %v5287_v11 = vld [vmem:[#allocation71_spill] sm:$0xff] }
 0x261   : > { %v3026_v26 = vpop.eup %3025  ;;  %2619 = vmatprep.mubr.f32.mxu1 %v1389_v35  ;;  %vm4327_vm9 = vcmp.lt.f32.partialorder %v1173_v2, 0.0004427343  ;;  %vm944_vm10 = vcmp.gt.f32.partialorder %v4082_v4, 14.0  ;;  %3033 = vlog2.f32 %v1203_v10  ;;  %v1206_v49 = vmul.f32 -0.5, %v4012_v60  ;;  %v5289_v10 = vld [vmem:[#allocation39_spill] sm:$0xff] }
 0x262   : > { %v1390_v41 = vsel %vm942_vm5, %v4035_v36, %v1358_v39  ;;  %v1169_v63 = vmul.f32 0.6931472, %v3026_v26  ;;  %v1189_v54 = vadd.f32 1.0, %v1188_v17  ;;  %v1212_v61 = vadd.f32 1.0, %v3997_v44  ;;  %v5288_v17 = vld [vmem:[#allocation68_spill] sm:$0xff] }
 0x263   : > { %2620 = vmatmul.mubr.f32.gmra.mrb[26].mxu1 %v1390_v41  ;;  %v1181_v22 = vmul.f32 %v4192_v8, %v1180_v0  ;;  %vm4338_vm11 = vcmp.lt.f32.partialorder %v1182_v15, 0.0004427343  ;;  %vm945_vm12 = vcmp.gt.f32.partialorder %v4145_v59, 14.0  ;;  %vm4343_vm13 = vcmp.lt.f32.partialorder %v1191_v1, 0.0004427343 }
 0x264   : > { %v1200_v48 = vand.u32 2147483647, %v4227_v14  ;;  %v3028_v36 = vpop.eup %3027  ;;  %v1175_v47 = vsel %vm4327_vm9, %v1172_v53, %v1169_v63  ;;  %v1198_v38 = vadd.f32 1.0, %v1197_v33  ;;  %3035 = vlog2.f32 %v1212_v61  ;;  %v5292_v53 = vld [vmem:[#allocation61_spill] sm:$0xff] }
 0x265   : > { %v1221_v8 = vadd.f32 1.0, %v4056_v51  ;;  %v1359_v18 = vmul.f32 2.0, %v1175_v47  ;;  %v1178_v45 = vmul.f32 0.6931472, %v3028_v36  ;;  %v1207_v43 = vadd.f32 1.0, %v1206_v49  ;;  %v5293_v49 = vld [vmem:[#allocation67_spill] sm:$0xff] }
 0x266   : > { %v1215_v62 = vmul.f32 -0.5, %v3997_v44  ;;  %v3030_v52 = vpop.eup %3029  ;;  %v1190_v20 = vmul.f32 %v4249_v7, %v1189_v54  ;;  %vm946_vm14 = vcmp.gt.f32.partialorder %v4121_v57, 14.0  ;;  %vm947_vm15 = vcmp.gt.f32.partialorder %v3911_v29, 14.0  ;;  %v5300_v29 = vld [vmem:[#allocation74_spill] sm:$0xff] }
 0x267   : > { %3037 = vlog2.f32 %v1221_v8  ;;  %v1224_v50 = vmul.f32 -0.5, %v4056_v51  ;;  %v1391_v37 = vsel %vm943_vm8, %v5280_v31, %v1359_v18  ;;  %v1184_v30 = vsel %vm4338_vm11, %v1181_v22, %v1178_v45  ;;  %v5298_v18 = vld [vmem:[#allocation43_spill] sm:$0xff]  ;;  %v5316_v22 = vld [vmem:[#allocation46_spill] sm:$0xff] }
 0x268   : > { %v1187_v58 = vmul.f32 0.6931472, %v3030_v52  ;;  %v1209_v6 = vand.u32 2147483647, %v4012_v60  ;;  %2622 = vmatprep.mubr.f32.mxu1 %v1391_v37  ;;  %v1360_v21 = vmul.f32 2.0, %v1184_v30  ;;  %v1199_v7 = vmul.f32 %v4227_v14, %v1198_v38  ;;  %v5297_v38 = vld [vmem:[#allocation80_spill] sm:$0xff] }
 0x269   : > { %vm4363_vm0 = vcmp.lt.f32.partialorder %v1200_v48, 0.0004427343  ;;  %v1218_v3 = vand.u32 2147483647, %v3997_v44  ;;  %v3032_v25 = vpop.eup %3031  ;;  %v1208_v46 = vmul.f32 %v4012_v60, %v1207_v43  ;;  %v1216_v40 = vadd.f32 1.0, %v1215_v62  ;;  %v5299_v43 = vld [vmem:[#allocation42_spill] sm:$0xff] }
 0x26a   : > { %v1193_v19 = vsel %vm4343_vm13, %v1190_v20, %v1187_v58  ;;  %v1230_v9 = vadd.f32 1.0, %v5283_v5  ;;  %v1392_v12 = vsel %vm944_vm10, %v5284_v28, %v1360_v21  ;;  %v1196_v2 = vmul.f32 0.6931472, %v3032_v25  ;;  %v5301_v20 = vld [vmem:[#allocation37_spill] sm:$0xff]  ;;  %v5307_v28 = vld [vmem:[#allocation78_spill] sm:$0xff] }
 0x26b   : > { %v1361_v14 = vmul.f32 2.0, %v1193_v19  ;;  %v1225_v34 = vadd.f32 1.0, %v1224_v50  ;;  %v3034_v27 = vpop.eup %3033  ;;  %2623 = vmatmul.mubr.f32.gmra.mrb[28].mxu1 %v1392_v12  ;;  %vm4375_vm1 = vcmp.lt.f32.partialorder %v1209_v6, 0.0004427343  ;;  %v1227_v56 = vand.u32 2147483647, %v4056_v51 }
 0x26c   : > { %3039 = vlog2.f32 %v1230_v9  ;;  %v1233_v60 = vmul.f32 -0.5, %v5283_v5  ;;  %v1202_v4 = vsel %vm4363_vm0, %v1199_v7, %v1196_v2  ;;  %v1205_v15 = vmul.f32 0.6931472, %v3034_v27  ;;  %v5304_v7 = vld [vmem:[#allocation73_spill] sm:$0xff] }
 0x26d   : > { %v1393_v0 = vsel %vm945_vm12, %v5287_v11, %v1361_v14  ;;  %v1239_v13 = vadd.f32 1.0, %v5288_v17  ;;  %v1362_v1 = vmul.f32 2.0, %v1202_v4  ;;  %vm948_vm2 = vcmp.gt.f32.partialorder %v5289_v10, 14.0  ;;  %v5310_v27 = vld [vmem:[#allocation45_spill] sm:$0xff]  ;;  %v5314_v10 = vld [vmem:[#allocation40_spill] sm:$0xff] }
 0x26e   : > { %2625 = vmatprep.mubr.f32.mxu1 %v1393_v0  ;;  %v1217_v35 = vmul.f32 %v3997_v44, %v1216_v40  ;;  %vm4389_vm3 = vcmp.lt.f32.partialorder %v1218_v3, 0.0004427343  ;;  %v3036_v33 = vpop.eup %3035  ;;  %v1211_v59 = vsel %vm4375_vm1, %v1208_v46, %v1205_v15  ;;  %v1226_v26 = vmul.f32 %v4056_v51, %v1225_v34  ;;  %v5305_v3 = vld [vmem:[#allocation41_spill] sm:$0xff] }
 0x26f   : > { %3041 = vlog2.f32 %v1239_v13  ;;  %v1248_v16 = vadd.f32 1.0, %v5292_v53  ;;  %v1394_v41 = vsel %vm946_vm14, %v5293_v49, %v1362_v1  ;;  %v1363_v63 = vmul.f32 2.0, %v1211_v59  ;;  %v5313_v13 = vld [vmem:[#allocation76_spill] sm:$0xff] }
 0x270   : > { %v1214_v54 = vmul.f32 0.6931472, %v3036_v33  ;;  %v1242_v44 = vmul.f32 -0.5, %v5288_v17  ;;  %2626 = vmatmul.mubr.f32.gmra.mrb[30].mxu1 %v1394_v41  ;;  %vm4401_vm4 = vcmp.lt.f32.partialorder %v1227_v56, 0.0004427343  ;;  %v1234_v32 = vadd.f32 1.0, %v1233_v60 }
 0x271   : > { %v3038_v61 = vpop.eup %3037  ;;  %v1236_v51 = vand.u32 2147483647, %v5283_v5  ;;  %3043 = vlog2.f32 %v1248_v16  ;;  %v1395_v48 = vsel %vm947_vm15, %v5296_v55, %v1363_v63  ;;  %v1251_v47 = vmul.f32 -0.5, %v5292_v53 }
 0x272   : > { %v1220_v57 = vsel %vm4389_vm3, %v1217_v35, %v1214_v54  ;;  %v1223_v36 = vmul.f32 0.6931472, %v3038_v61  ;;  %3045 = vpow2.f32 %v5297_v38  ;;  %2628 = vmatprep.mubr.f32.mxu1 %v1395_v48  ;;  %vm949_vm5 = vcmp.gt.f32.partialorder %v5298_v18, 14.0 }
 0x273   : > { %v1364_v8 = vmul.f32 2.0, %v1220_v57  ;;  %vm950_vm6 = vcmp.gt.f32.partialorder %v5299_v43, 14.0  ;;  %v1243_v62 = vadd.f32 1.0, %v1242_v44  ;;  %v1257_v52 = vadd.f32 1.0, %v5300_v29  ;;  %v5315_v44 = vld [vmem:[#allocation81_spill] sm:$0xff]  ;;  %v5321_v43 = vld [vmem:[#allocation50_spill] sm:$0xff] }
 0x274   : > { %v1229_v45 = vsel %vm4401_vm4, %v1226_v26, %v1223_v36  ;;  %v1235_v37 = vmul.f32 %v5283_v5, %v1234_v32  ;;  %v1245_v30 = vand.u32 2147483647, %v5288_v17  ;;  %vm4423_vm7 = vcmp.lt.f32.partialorder %v1236_v51, 0.0004427343  ;;  %v5306_v5 = vld [vmem:[#allocation48_spill] sm:$0xff]  ;;  %v5317_v36 = vld [vmem:[#allocation51_spill] sm:$0xff] }
 0x275   : > { %v1396_v50 = vsel %vm948_vm2, %v5301_v20, %v1364_v8  ;;  %v1365_v31 = vmul.f32 2.0, %v1229_v45  ;;  %v1252_v21 = vadd.f32 1.0, %v1251_v47  ;;  %3047 = vlog2.f32 %v1257_v52  ;;  %v5320_v8 = vld [vmem:[#allocation44_spill] sm:$0xff] }
 0x276   : > { %v3040_v58 = vpop.eup %3039  ;;  %2629 = vmatmul.mubr.f32.gmra.mrb[32].mxu1 %v1396_v50  ;;  %v1266_v24 = vadd.f32 1.0, %v5304_v7  ;;  %v1254_v46 = vand.u32 2147483647, %v5292_v53  ;;  %v1260_v40 = vmul.f32 -0.5, %v5300_v29  ;;  %vm951_vm8 = vcmp.gt.f32.partialorder %v5306_v5, 14.0  ;;  %v5327_v5 = vld [vmem:[#allocation83_spill] sm:$0xff] }
 0x277   : > { %v1397_v25 = vsel %vm949_vm5, %v5305_v3, %v1365_v31  ;;  %v1232_v19 = vmul.f32 0.6931472, %v3040_v58  ;;  %v1244_v9 = vmul.f32 %v5288_v17, %v1243_v62  ;;  %v1275_v12 = vadd.f32 1.0, %v5307_v28  ;;  %v5326_v31 = vld [vmem:[#allocation79_spill] sm:$0xff] }
 0x278   : > { %2631 = vmatprep.mubr.f32.mxu1 %v1397_v25  ;;  %3049 = vlog2.f32 %v1266_v24  ;;  %vm4436_vm9 = vcmp.lt.f32.partialorder %v1245_v30, 0.0004427343  ;;  %vm952_vm10 = vcmp.gt.f32.partialorder %v5310_v27, 14.0  ;;  %v1269_v42 = vmul.f32 -0.5, %v5304_v7 }
 0x279   : > { %v3042_v14 = vpop.eup %3041  ;;  %v1238_v2 = vsel %vm4423_vm7, %v1235_v37, %v1232_v19  ;;  %v1253_v11 = vmul.f32 %v5292_v53, %v1252_v21  ;;  %3051 = vlog2.f32 %v1275_v12  ;;  %vm4443_vm11 = vcmp.lt.f32.partialorder %v1254_v46, 0.0004427343  ;;  %v5328_v12 = vld [vmem:[#allocation49_spill] sm:$0xff] }
 0x27a   : > { %v1366_v56 = vmul.f32 2.0, %v1238_v2  ;;  %v1241_v60 = vmul.f32 0.6931472, %v3042_v14  ;;  %v1261_v15 = vadd.f32 1.0, %v1260_v40  ;;  %v1278_v17 = vmul.f32 -0.5, %v5307_v28  ;;  %v5329_v2 = vld [vmem:[#allocation56_spill] sm:$0xff] }
 0x27b   : > { %v3044_v0 = vpop.eup %3043  ;;  %v1284_v1 = vadd.f32 1.0, %v5313_v13  ;;  %v1263_v59 = vand.u32 2147483647, %v5300_v29  ;;  %v1270_v16 = vadd.f32 1.0, %v1269_v42  ;;  %v1272_v49 = vand.u32 2147483647, %v5304_v7 }
 0x27c   : > { %v1398_v35 = vsel %vm950_vm6, %v5314_v10, %v1366_v56  ;;  %v1247_v39 = vsel %vm4436_vm9, %v1244_v9, %v1241_v60  ;;  %v1250_v33 = vmul.f32 0.6931472, %v3044_v0  ;;  %v4455_v26 = vpop.eup %3045  ;;  %v1281_v63 = vand.u32 2147483647, %v5307_v28  ;;  %v5330_v56 = vld [vmem:[#allocation53_spill] sm:$0xff] }
 0x27d   : > { %2632 = vmatmul.mubr.f32.gmra.mrb[34].mxu1 %v1398_v35  ;;  %v1367_v53 = vmul.f32 2.0, %v1247_v39  ;;  %3053 = vlog2.f32 %v1284_v1  ;;  %v1287_v54 = vmul.f32 -0.5, %v5313_v13  ;;  %v1293_v61 = vadd.f32 1.0, %v5315_v44  ;;  %v5336_v35 = vld [vmem:[#allocation82_spill] sm:$0xff] }
 0x27e   : > { %v1256_v41 = vsel %vm4443_vm11, %v1253_v11, %v1250_v33  ;;  %v1262_v55 = vmul.f32 %v5300_v29, %v1261_v15  ;;  %v1279_v48 = vadd.f32 1.0, %v1278_v17  ;;  %vm953_vm12 = vcmp.gt.f32.partialorder %v5317_v36, 14.0  ;;  %v5333_v11 = vld [vmem:[#allocation47_spill] sm:$0xff] }
 0x27f   : > { %v1399_v32 = vsel %vm951_vm8, %v5316_v22, %v1367_v53  ;;  %v1368_v51 = vmul.f32 2.0, %v1256_v41  ;;  %v3048_v57 = vpop.eup %3047  ;;  %vm4468_vm13 = vcmp.lt.f32.partialorder %v1263_v59, 0.0004427343  ;;  %3055 = vlog2.f32 %v1293_v61  ;;  %v5337_v59 = vld [vmem:[#allocation54_spill] sm:$0xff] }
 0x280   : > { %2634 = vmatprep.mubr.f32.mxu1 %v1399_v32  ;;  %v1296_v38 = vmul.f32 -0.5, %v5315_v44  ;;  %v1259_v45 = vmul.f32 0.6931472, %v3048_v57  ;;  %vm954_vm14 = vcmp.gt.f32.partialorder %v5321_v43, 14.0  ;;  %v1271_v62 = vmul.f32 %v5304_v7, %v1270_v16  ;;  %v5338_v61 = vld [vmem:[#allocation62_spill] sm:$0xff] }
 0x281   : > { %v1400_v18 = vsel %vm952_vm10, %v5320_v8, %v1368_v51  ;;  %vm4478_vm15 = vcmp.lt.f32.partialorder %v1272_v49, 0.0004427343  ;;  %vm4482_vm0 = vcmp.lt.f32.partialorder %v1281_v63, 0.0004427343  ;;  %v1288_v50 = vadd.f32 1.0, %v1287_v54  ;;  %v5339_v51 = vld [vmem:[#allocation52_spill] sm:$0xff] }
 0x282   : > { %v3050_v29 = vpop.eup %3049  ;;  %2635 = vmatmul.mubr.f32.gmra.mrb[36].mxu1 %v1400_v18  ;;  %v1302_v37 = vadd.f32 1.0, %v5326_v31  ;;  %v1265_v30 = vsel %vm4468_vm13, %v1262_v55, %v1259_v45  ;;  %v1280_v6 = vmul.f32 %v5307_v28, %v1279_v48  ;;  %v1290_v21 = vand.u32 2147483647, %v5313_v13  ;;  %v5340_v18 = vld [vmem:[#allocation58_spill] sm:$0xff] }
 0x283   : > { %v1268_v58 = vmul.f32 0.6931472, %v3050_v29  ;;  %v3052_v7 = vpop.eup %3051  ;;  %v1369_v24 = vmul.f32 2.0, %v1265_v30  ;;  %v1297_v3 = vadd.f32 1.0, %v1296_v38  ;;  %v1299_v25 = vand.u32 2147483647, %v5315_v44 }
 0x284   : > { %3057 = vlog2.f32 %v1302_v37  ;;  %v1277_v46 = vmul.f32 0.6931472, %v3052_v7  ;;  %v1305_v40 = vmul.f32 -0.5, %v5326_v31  ;;  %v1311_v9 = vadd.f32 1.0, %v5327_v5 }
 0x285   : > { %v1274_v19 = vsel %vm4478_vm15, %v1271_v62, %v1268_v58  ;;  %v1401_v28 = vsel %vm953_vm12, %v5328_v12, %v1369_v24  ;;  %vm955_vm1 = vcmp.gt.f32.partialorder %v5329_v2, 14.0  ;;  %v1289_v34 = vmul.f32 %v5313_v13, %v1288_v50  ;;  %v5343_v62 = vld [vmem:[#allocation59_spill] sm:$0xff]  ;;  %v5344_v24 = vld [vmem:[#allocation57_spill] sm:$0xff] }
 0x286   : > { %v1370_v14 = vmul.f32 2.0, %v1274_v19  ;;  %2637 = vmatprep.mubr.f32.mxu1 %v1401_v28  ;;  %v1283_v42 = vsel %vm4482_vm0, %v1280_v6, %v1277_v46  ;;  %vm956_vm2 = vcmp.gt.f32.partialorder %v5330_v56, 14.0  ;;  %vm4504_vm3 = vcmp.lt.f32.partialorder %v1290_v21, 0.0004427343  ;;  %v5347_v56 = vld [vmem:[#allocation65_spill] sm:$0xff] }
 0x287   : > { %v3054_v27 = vpop.eup %3053  ;;  %3059 = vlog2.f32 %v1311_v9  ;;  %v1371_v4 = vmul.f32 2.0, %v1283_v42  ;;  %v1314_v17 = vmul.f32 -0.5, %v5327_v5  ;;  %v1298_v13 = vmul.f32 %v5315_v44, %v1297_v3 }
 0x288   : > { %v1402_v0 = vsel %vm954_vm14, %v5333_v11, %v1370_v14  ;;  %v1286_v15 = vmul.f32 0.6931472, %v3054_v27  ;;  %vm4513_vm4 = vcmp.lt.f32.partialorder %v1299_v25, 0.0004427343  ;;  %v1306_v10 = vadd.f32 1.0, %v1305_v40  ;;  %v5345_v25 = vld [vmem:[#allocation69_spill] sm:$0xff] }
 0x289   : > { %2638 = vmatmul.mubr.f32.gmra.mrb[38].mxu1 %v1402_v0  ;;  %v1320_v39 = vadd.f32 1.0, %v5336_v35  ;;  %v3056_v33 = vpop.eup %3055  ;;  %v1403_v53 = vsel %vm955_vm1, %v5337_v59, %v1371_v4  ;;  %v1308_v49 = vand.u32 2147483647, %v5326_v31  ;;  %v1329_v41 = vadd.f32 1.0, %v4455_v26  ;;  %v5348_v0 = vld [vmem:[#allocation77_spill] sm:$0xff] }
 0x28a   : > { %v1292_v16 = vsel %vm4504_vm3, %v1289_v34, %v1286_v15  ;;  %2640 = vmatprep.mubr.f32.mxu1 %v1403_v53  ;;  %v1295_v54 = vmul.f32 0.6931472, %v3056_v33  ;;  %v1317_v44 = vand.u32 2147483647, %v5327_v5  ;;  %vm957_vm5 = vcmp.gt.f32.partialorder %v5338_v61, 14.0  ;;  %v5346_v34 = vld [vmem:[#allocation66_spill] sm:$0xff] }
 0x28b   : > { %v1372_v63 = vmul.f32 2.0, %v1292_v16  ;;  %3061 = vlog2.f32 %v1320_v39  ;;  %v1315_v22 = vadd.f32 1.0, %v1314_v17  ;;  %v1323_v32 = vmul.f32 -0.5, %v5336_v35  ;;  %v5352_v33 = vld [vmem:[#allocation75_spill] sm:$0xff]  ;;  %v5353_v16 = vld [vmem:[#allocation70_spill] sm:$0xff] }
 0x28c   : > { %3063 = vlog2.f32 %v1329_v41  ;;  %v1301_v48 = vsel %vm4513_vm4, %v1298_v13, %v1295_v54  ;;  %v1307_v57 = vmul.f32 %v5326_v31, %v1306_v10  ;;  %v1332_v36 = vmul.f32 -0.5, %v4455_v26  ;;  %v5350_v13 = vld [vmem:[#allocation63_spill] sm:$0xff] }
 0x28d   : > { %v1404_v55 = vsel %vm956_vm2, %v5339_v51, %v1372_v63  ;;  %v1373_v38 = vmul.f32 2.0, %v1301_v48  ;;  %vm1309_vm6 = vcmp.lt.f32.partialorder %v1308_v49, 0.0004427343  ;;  %v1338_v8 = vadd.f32 1.0, %v4313_v23 }
 0x28e   : > { %v3058_v47 = vpop.eup %3057  ;;  %2641 = vmatmul.mubr.f32.gmra.mrb[40].mxu1 %v1404_v55  ;;  %vm958_vm7 = vcmp.gt.f32.partialorder %v5340_v18, 14.0  ;;  %vm4537_vm8 = vcmp.lt.f32.partialorder %v1317_v44, 0.0004427343  ;;  %v1316_v52 = vmul.f32 %v5327_v5, %v1315_v22  ;;  %v1324_v20 = vadd.f32 1.0, %v1323_v32 }
 0x28f   : > { %v1304_v45 = vmul.f32 0.6931472, %v3058_v47  ;;  %v1405_v29 = vsel %vm957_vm5, %v5343_v62, %v1373_v38  ;;  %3065 = vlog2.f32 %v1338_v8  ;;  %v1326_v37 = vand.u32 2147483647, %v5336_v35  ;;  %v1660_v62 = vld [vmem:[%s3797_s4 + $0x8] sm:$0xff] }
 0x290   : > { %2643 = vmatprep.mubr.f32.mxu1 %v1405_v29  ;;  %v1333_v30 = vadd.f32 1.0, %v1332_v36  ;;  %v1341_v58 = vmul.f32 -0.5, %v4313_v23  ;;  %v1335_v7 = vand.u32 2147483647, %v4455_v26  ;;  %vm959_vm9 = vcmp.gt.f32.partialorder %v5345_v25, 14.0  ;;  %v1661_v25 = vld [vmem:[%s3797_s4 + $0x10] sm:$0xff] }
 0x291   : > { %v3060_v50 = vpop.eup %3059  ;;  %v1310_v31 = vsel %vm1309_vm6, %v1307_v57, %v1304_v45  ;;  %v1325_v46 = vmul.f32 %v5336_v35, %v1324_v20  ;;  %vm1327_vm10 = vcmp.lt.f32.partialorder %v1326_v37, 0.0004427343  ;;  %v1344_v2 = vand.u32 2147483647, %v4313_v23  ;;  %v5351_v35 = vld [vmem:[#allocation72_spill] sm:$0xff] }
 0x292   : > { %v1374_v6 = vmul.f32 2.0, %v1310_v31  ;;  %v1313_v21 = vmul.f32 0.6931472, %v3060_v50  ;;  %v1334_v9 = vmul.f32 %v4455_v26, %v1333_v30  ;;  %v1342_v12 = vadd.f32 1.0, %v1341_v58  ;;  %v4632_v45 = vld [vmem:[%s5355_s27] ss:$0 sm:$0xff] }
 0x293   : > { %vm1336_vm11 = vcmp.lt.f32.partialorder %v1335_v7, 0.0004427343  ;;  %vm960_vm12 = vcmp.gt.f32.partialorder %v5347_v56, 14.0  ;;  %vm961_vm13 = vcmp.gt.f32.partialorder %v5348_v0, 14.0  ;;  %vm1345_vm14 = vcmp.lt.f32.partialorder %v1344_v2, 0.0004427343 }
 0x294   : > { %v1406_v3 = vsel %vm958_vm7, %v5344_v24, %v1374_v6  ;;  %v1319_v19 = vsel %vm4537_vm8, %v1316_v52, %v1313_v21  ;;  %v1343_v26 = vmul.f32 %v4313_v23, %v1342_v12  ;;  %vm962_vm15 = vcmp.gt.f32.partialorder %v5352_v33, 14.0  ;;  %v1723_v23 = vld [vmem:[%s546_s6] sm:$0x3]  ;;  %v1659_v50 = vld [vmem:[%s3797_s4] sm:$0xff]  ;;  %v1664_v12 = vld [vmem:[%s3797_s4 + $0x28] sm:$0xff] }
 0x295   : > { %v3062_v40 = vpop.eup %3061  ;;  %2644 = vmatmul.mubr.f32.gmra.mrb[42].mxu1 %v1406_v3  ;;  %v1375_v5 = vmul.f32 2.0, %v1319_v19  ;;  %v1727_v41 = vlaneseq  ;;  %v1725_v63 = vstv %s2223_s0  ;;  %v3365_v57 = vmov 1.0   ;;  %v1662_v7 = vld [vmem:[%s3797_s4 + $0x18] sm:$0xff]  ;;  %v1663_v2 = vld [vmem:[%s3797_s4 + $0x20] sm:$0xff]  ;;  %v1668_v33 = vld [vmem:[%s3797_s4 + $0x48] sm:$0xff] }
 0x296   : > { %v3064_v28 = vpop.eup %3063  ;;  %v1322_v14 = vmul.f32 0.6931472, %v3062_v40  ;;  %v1726_v54 = vsub.s32 %v1723_v23, %v1725_v63  ;;  %v1666_v0 = vld [vmem:[%s3797_s4 + $0x38] sm:$0xff]  ;;  %v1667_v23 = vld [vmem:[%s3797_s4 + $0x40] sm:$0xff] }
 0x297   : > { %v1407_v27 = vsel %vm959_vm9, %v5346_v34, %v1375_v5  ;;  %v1331_v42 = vmul.f32 0.6931472, %v3064_v28  ;;  %v4571_v44 = vshrl.u32 %v1727_v41, 7 }
 0x298   : > { %2646 = vmatprep.mubr.f32.mxu1 %v1407_v27  ;;  %v1328_v60 = vsel %vm1327_vm10, %v1325_v46, %v1322_v14 }
 0x299   : > { %v1376_v11 = vmul.f32 2.0, %v1328_v60  ;;  %v1337_v4 = vsel %vm1336_vm11, %v1334_v9, %v1331_v42  ;;  %v3066_v15 = vpop.eup %3065  ;;  %v1746_v61 = vsub.s32 0, %v4571_v44  ;;  %v1750_v22 = vsub.s32 1, %v4571_v44 }
 0x29a   : > { %v1377_v17 = vmul.f32 2.0, %v1337_v4  ;;  %v1340_v10 = vmul.f32 0.6931472, %v3066_v15  ;;  %v4576_v32 = vadd.s32 8, %v4571_v44  ;;  %v4583_v48 = vadd.s32 16, %v4571_v44 }
 0x29b   : > { %v1408_v1 = vsel %vm960_vm12, %v5350_v13, %v1376_v11  ;;  %v4578_v51 = vrot.slane %v1726_v54, %v1746_v61  ;;  %v4580_v55 = vrot.slane %v1726_v54, %v1750_v22  ;;  %v4599_v36 = vadd.s32 24, %v4571_v44 }
 0x29c   : > { %2647 = vmatmul.mubr.f32.gmra.mrb[44].mxu1 %v1408_v1  ;;  %v1409_v39 = vsel %vm961_vm13, %v5351_v35, %v1377_v17  ;;  %v1346_v59 = vsel %vm1345_vm14, %v1343_v26, %v1340_v10  ;;  %v4606_v47 = vadd.s32 32, %v4571_v44  ;;  %v4613_v38 = vadd.s32 40, %v4571_v44  ;;  %v1665_v17 = vld [vmem:[%s3797_s4 + $0x30] sm:$0xff] }
 0x29d   : > { %2649 = vmatprep.mubr.f32.mxu1 %v1409_v39  ;;  %v1378_v53 = vmul.f32 2.0, %v1346_v59  ;;  %vm1753_vm0 = vcmp.eq.s32.totalorder %v4571_v44, %v4580_v55  ;;  %vm1752_vm1 = vcmp.eq.s32.totalorder %v4571_v44, %v4578_v51  ;;  %vm1755_vm2 = vcmp.eq.s32.totalorder %v4576_v32, %v4580_v55 }
 0x29e   : > { %vm1754_vm3 = vcmp.eq.s32.totalorder %v4576_v32, %v4578_v51  ;;  %2256 = vmatprep.mubr.msk.f32.mxu0 %vm1753_vm0, %v3365_v57  ;;  %vm1757_vm4 = vcmp.eq.s32.totalorder %v4583_v48, %v4580_v55  ;;  %vm1756_vm5 = vcmp.eq.s32.totalorder %v4583_v48, %v4578_v51  ;;  %vm1759_vm6 = vcmp.eq.s32.totalorder %v4599_v36, %v4580_v55  ;;  %v1848_v32 = vld [vmem:[%s3829_s29] sm:$0xff] }
 0x29f   : > { %v1410_v49 = vsel %vm962_vm15, %v5353_v16, %v1378_v53  ;;  %vm1758_vm7 = vcmp.eq.s32.totalorder %v4599_v36, %v4578_v51  ;;  %vm1761_vm8 = vcmp.eq.s32.totalorder %v4606_v47, %v4580_v55  ;;  %vm1760_vm9 = vcmp.eq.s32.totalorder %v4606_v47, %v4578_v51 }
 0x2a0   : > { %2650 = vmatmul.mubr.f32.gmra.mrb[46].mxu1 %v1410_v49  ;;  %vm1763_vm10 = vcmp.eq.s32.totalorder %v4613_v38, %v4580_v55  ;;  %vm1762_vm11 = vcmp.eq.s32.totalorder %v4613_v38, %v4578_v51  ;;  %v4620_v8 = vadd.s32 48, %v4571_v44  ;;  %v4627_v18 = vadd.s32 56, %v4571_v44 }
 0x2a1   : > { %v4640_v29 = vadd.s32 64, %v4571_v44  ;;  %v4654_v58 = vadd.s32 72, %v4571_v44  ;;  %v4667_v46 = vadd.s32 80, %v4571_v44  ;;  %v4684_v42 = vadd.s32 88, %v4571_v44 }
 0x2a2   : > { %vm1765_vm12 = vcmp.eq.s32.totalorder %v4620_v8, %v4580_v55  ;;  %vm1764_vm13 = vcmp.eq.s32.totalorder %v4620_v8, %v4578_v51  ;;  %v4700_v13 = vadd.s32 96, %v4571_v44  ;;  %v4713_v59 = vadd.s32 104, %v4571_v44  ;;  %v1849_v8 = vld [vmem:[%s3829_s29 + $0x8] sm:$0xff] }
 0x2a3   : > { %v4729_v61 = vadd.s32 112, %v4571_v44 }
 0x2a4   : > { %vm1778_vm0 = vcmp.eq.s32.totalorder %v4713_v59, %v4578_v51 }
 0x31b   : > { %v2606_v43 = vpop.f32.mrb[16].mxu1 }
 0x31c   : > { %v1506_v52 = vadd.f32 %v2606_v43, %v4632_v45  ;;  %v1500_v20 = vpop.f32.mrb[17].mxu1 }
 0x31d   : > { %v1501_v31 = vadd.f32 %v4632_v45, %v1500_v20 }
 0x31e   : > { %v4649_v37 = vmul.f32 %v1660_v62, %v1506_v52  ;;  %v1670_v62 = vld [vmem:[%s3797_s4 + $0x58] sm:$0xff] }
 0x31f   : > { %v4651_v30 = vmul.f32 %v1659_v50, %v1501_v31  ;;  %v1669_v50 = vld [vmem:[%s3797_s4 + $0x50] sm:$0xff]  ;;  %v4741_v31 = vadd.s32 120, %v4571_v44 }
 0x321   : > { %v2718_v6 = vpack.c.bf16 %v4649_v37, %v4651_v30  ;;  %v2609_v21 = vpop.f32.mrb[18].mxu1  ;;  %vm1783_vm15 = vcmp.eq.s32.totalorder %v4741_v31, %v4580_v55  ;;  %vm1782_vm14 = vcmp.eq.s32.totalorder %v4741_v31, %v4578_v51 }
 0x322   : > { %v1516_v24 = vadd.f32 %v2609_v21, %v4632_v45  ;;  %v1510_v3 = vpop.f32.mrb[19].mxu1 }
 0x323   : > { %v1511_v19 = vadd.f32 %v4632_v45, %v1510_v3 }
 0x324   : > { %v4669_v40 = vmul.f32 %v1662_v7, %v1516_v24 }
 0x325   : > { %v4671_v5 = vmul.f32 %v1661_v25, %v1511_v19  ;;  %v2612_v9 = vpop.f32.mrb[20].mxu1  ;;  %v1672_v19 = vld [vmem:[%s3797_s4 + $0x68] sm:$0xff] }
 0x326   : > { %v1526_v28 = vadd.f32 %v2612_v9, %v4632_v45  ;;  %v1520_v14 = vpop.f32.mrb[21].mxu1 }
 0x327   : > { %v2722_v34 = vpack.c.bf16 %v4669_v40, %v4671_v5  ;;  %v1521_v27 = vadd.f32 %v4632_v45, %v1520_v14  ;;  %v1684_v5 = vld [vmem:[%s3797_s4 + $0xc8] sm:$0xff] }
 0x328   : > { %v4686_v56 = vmul.f32 %v1664_v12, %v1526_v28  ;;  %v1671_v28 = vld [vmem:[%s3797_s4 + $0x60] sm:$0xff] }
 0x329   : > { %v4688_v60 = vmul.f32 %v1663_v2, %v1521_v27 }
 0x32a   : > { %v2615_v11 = vpop.f32.mrb[22].mxu1 }
 0x32b   : > { %v2726_v4 = vpack.c.bf16 %v4686_v56, %v4688_v60  ;;  %v1536_v26 = vadd.f32 %v2615_v11, %v4632_v45  ;;  %v1530_v15 = vpop.f32.mrb[23].mxu1 }
 0x32c   : > { %v1531_v1 = vadd.f32 %v4632_v45, %v1530_v15 }
 0x32d   : > { %v4703_v10 = vmul.f32 %v1666_v0, %v1536_v26  ;;  %v1674_v0 = vld [vmem:[%s3797_s4 + $0x78] sm:$0xff] }
 0x32e   : > { %v4709_v35 = vmul.f32 %v1665_v17, %v1531_v1  ;;  %v1673_v1 = vld [vmem:[%s3797_s4 + $0x70] sm:$0xff] }
 0x32f   : > { %v2618_v39 = vpop.f32.mrb[24].mxu1 }
 0x330   : > { %v2730_v53 = vpack.c.bf16 %v4703_v10, %v4709_v35  ;;  %v1546_v16 = vadd.f32 %v2618_v39, %v4632_v45  ;;  %v1540_v49 = vpop.f32.mrb[25].mxu1 }
 0x331   : > { %v1541_v41 = vadd.f32 %v4632_v45, %v1540_v49 }
 0x332   : > { %v4724_v63 = vmul.f32 %v1668_v33, %v1546_v16 }
 0x333   : > { %v4726_v54 = vmul.f32 %v1667_v23, %v1541_v41  ;;  %v1676_v23 = vld [vmem:[%s3797_s4 + $0x88] sm:$0xff] }
 0x335   : > { %v2734_v22 = vpack.c.bf16 %v4724_v63, %v4726_v54 }
 0x336   : > { %v2621_v43 = vpop.f32.mrb[26].mxu1 }
 0x337   : > { %v1556_v52 = vadd.f32 %v2621_v43, %v4632_v45  ;;  %v1550_v20 = vpop.f32.mrb[27].mxu1 }
 0x338   : > { %v1551_v21 = vadd.f32 %v4632_v45, %v1550_v20 }
 0x339   : > { %v4744_v7 = vmul.f32 %v1670_v62, %v1556_v52  ;;  %v1675_v52 = vld [vmem:[%s3797_s4 + $0x80] sm:$0xff] }
 0x33a   : > { %v4750_v24 = vmul.f32 %v1669_v50, %v1551_v21 }
 0x33c   : > { %v2738_v3 = vpack.c.bf16 %v4744_v7, %v4750_v24 }
 0x33e   : > { %v2624_v25 = vpop.f32.mrb[28].mxu1 }
 0x33f   : > { %v1566_v9 = vadd.f32 %v2624_v25, %v4632_v45  ;;  %v1560_v12 = vpop.f32.mrb[29].mxu1 }
 0x340   : > { %v1561_v14 = vadd.f32 %v4632_v45, %v1560_v12 }
 0x341   : > { %v4758_v2 = vmul.f32 %v1672_v19, %v1566_v9  ;;  %v1678_v9 = vld [vmem:[%s3797_s4 + $0x98] sm:$0xff] }
 0x342   : > { %v4760_v27 = vmul.f32 %v1671_v28, %v1561_v14  ;;  %v1677_v14 = vld [vmem:[%s3797_s4 + $0x90] sm:$0xff] }
 0x343   : > { %v2627_v11 = vpop.f32.mrb[30].mxu1 }
 0x344   : > { %v2742_v26 = vpack.c.bf16 %v4758_v2, %v4760_v27  ;;  %v1576_v15 = vadd.f32 %v2627_v11, %v4632_v45  ;;  %v1570_v17 = vpop.f32.mrb[31].mxu1 }
 0x345   : > { %v1571_v39 = vadd.f32 %v4632_v45, %v1570_v17 }
 0x346   : > { %v4768_v33 = vmul.f32 %v1674_v0, %v1576_v15 }
 0x347   : > { %v4770_v16 = vmul.f32 %v1673_v1, %v1571_v39  ;;  %v1680_v1 = vld [vmem:[%s3797_s4 + $0xa8] sm:$0xff] }
 0x349   : > { %v2630_v49 = vpop.f32.mrb[32].mxu1  ;;  %v2746_v41 = vpack.c.bf16 %v4768_v33, %v4770_v16  ;;  %v1853_v16 = vld [vmem:[%s3829_s29 + $0x28] sm:$0xff] }
 0x34a   : > { %v1586_v43 = vadd.f32 %v2630_v49, %v4632_v45  ;;  %v1580_v62 = vpop.f32.mrb[33].mxu1 }
 0x34b   : > { %v1581_v20 = vadd.f32 %v4632_v45, %v1580_v62 }
 0x34c   : > { %v1708_v50 = vmul.f32 %v1676_v23, %v1586_v43  ;;  %v1679_v23 = vld [vmem:[%s3797_s4 + $0xa0] sm:$0xff] }
 0x34d   : > { %v1707_v21 = vmul.f32 %v1675_v52, %v1581_v20 }
 0x34f   : > { %v2716_v25 = vpack.c.bf16 %v1708_v50, %v1707_v21 }
 0x350   : > { %v2633_v19 = vpop.f32.mrb[34].mxu1 }
 0x351   : > { %v1596_v12 = vadd.f32 %v2633_v19, %v4632_v45  ;;  %v1590_v28 = vpop.f32.mrb[35].mxu1  ;;  %2717 = vmatprep.subr.bf16.mxu0 %v2716_v25  ;;  %v1681_v25 = vld [vmem:[%s3797_s4 + $0xb0] sm:$0xff] }
 0x352   : > { %v1591_v11 = vadd.f32 %v4632_v45, %v1590_v28  ;;  %2719 = vmatpush3.bf16.msra.mxu0 %v2718_v6  ;;  %v1682_v6 = vld [vmem:[%s3797_s4 + $0xb8] sm:$0xff] }
 0x353   : > { %v1710_v0 = vmul.f32 %v1678_v9, %v1596_v12 }
 0x354   : > { %v1709_v15 = vmul.f32 %v1677_v14, %v1591_v11  ;;  %v1683_v14 = vld [vmem:[%s3797_s4 + $0xc0] sm:$0xff] }
 0x355   : > { %v2636_v17 = vpop.f32.mrb[36].mxu1 }
 0x356   : > { %v1606_v39 = vadd.f32 %v2636_v17, %v4632_v45  ;;  %v1600_v49 = vpop.f32.mrb[37].mxu1  ;;  %v2720_v43 = vpack.c.bf16 %v1710_v0, %v1709_v15 }
 0x357   : > { %v1601_v62 = vadd.f32 %v4632_v45, %v1600_v49  ;;  %v1685_v49 = vld [vmem:[%s3797_s4 + $0xd0] sm:$0xff] }
 0x358   : > { %v1712_v52 = vmul.f32 %v1680_v1, %v1606_v39  ;;  %2721 = vmatprep.subr.bf16.mxu0 %v2720_v43 }
 0x359   : > { %v1711_v20 = vmul.f32 %v1679_v23, %v1601_v62  ;;  %2723 = vmatpush3.bf16.msra.mxu0 %v2722_v34 }
 0x35b   : > { %v2724_v37 = vpack.c.bf16 %v1712_v52, %v1711_v20 }
 0x35c   : > { %v2639_v30 = vpop.f32.mrb[38].mxu1 }
 0x35d   : > { %v1616_v50 = vadd.f32 %v2639_v30, %v4632_v45  ;;  %v1610_v21 = vpop.f32.mrb[39].mxu1  ;;  %2725 = vmatprep.subr.bf16.mxu0 %v2724_v37  ;;  %v1687_v37 = vld [vmem:[%s3797_s4 + $0xe0] sm:$0xff] }
 0x35e   : > { %v1611_v19 = vadd.f32 %v4632_v45, %v1610_v21  ;;  %2727 = vmatpush3.bf16.msra.mxu0 %v2726_v4  ;;  %v1686_v4 = vld [vmem:[%s3797_s4 + $0xd8] sm:$0xff] }
 0x35f   : > { %v1714_v9 = vmul.f32 %v1682_v6, %v1616_v50  ;;  %v1690_v6 = vld [vmem:[%s3797_s4 + $0xf8] sm:$0xff] }
 0x360   : > { %v1713_v12 = vmul.f32 %v1681_v25, %v1611_v19  ;;  %v1689_v25 = vld [vmem:[%s3797_s4 + $0xf0] sm:$0xff] }
 0x361   : > { %v2642_v40 = vpop.f32.mrb[40].mxu1 }
 0x362   : > { %v1626_v34 = vadd.f32 %v2642_v40, %v4632_v45  ;;  %v1620_v28 = vpop.f32.mrb[41].mxu1  ;;  %v2728_v11 = vpack.c.bf16 %v1714_v9, %v1713_v12 }
 0x363   : > { %v1621_v0 = vadd.f32 %v4632_v45, %v1620_v28 }
 0x364   : > { %v1716_v15 = vmul.f32 %v1684_v5, %v1626_v34  ;;  %2729 = vmatprep.subr.bf16.mxu0 %v2728_v11 }
 0x365   : > { %v1715_v17 = vmul.f32 %v1683_v14, %v1621_v0  ;;  %2731 = vmatpush3.bf16.msra.mxu0 %v2730_v53  ;;  %v1688_v53 = vld [vmem:[%s3797_s4 + $0xe8] sm:$0xff]  ;;  %v1854_v14 = vld [vmem:[%s3829_s29 + $0x30] sm:$0xff] }
 0x367   : > { %v2732_v56 = vpack.c.bf16 %v1716_v15, %v1715_v17 }
 0x368   : > { %v2645_v60 = vpop.f32.mrb[42].mxu1 }
 0x369   : > { %v1636_v1 = vadd.f32 %v2645_v60, %v4632_v45  ;;  %v1630_v39 = vpop.f32.mrb[43].mxu1  ;;  %2733 = vmatprep.subr.bf16.mxu0 %v2732_v56  ;;  %v1855_v56 = vld [vmem:[%s3829_s29 + $0x38] sm:$0xff] }
 0x36a   : > { %v1631_v23 = vadd.f32 %v4632_v45, %v1630_v39  ;;  %2735 = vmatpush3.bf16.msra.mxu0 %v2734_v22 }
 0x36b   : > { %v1718_v43 = vmul.f32 %v1686_v4, %v1636_v1 }
 0x36c   : > { %v1717_v62 = vmul.f32 %v1685_v49, %v1631_v23  ;;  %v1856_v49 = vld [vmem:[%s3829_s29 + $0x40] sm:$0xff] }
 0x36e   : > { %v2736_v10 = vpack.c.bf16 %v1718_v43, %v1717_v62 }
 0x36f   : > { %v2648_v35 = vpop.f32.mrb[44].mxu1 }
 0x370   : > { %v1646_v52 = vadd.f32 %v2648_v35, %v4632_v45  ;;  %v1640_v20 = vpop.f32.mrb[45].mxu1  ;;  %2737 = vmatprep.subr.bf16.mxu0 %v2736_v10  ;;  %v1857_v35 = vld [vmem:[%s3829_s29 + $0x48] sm:$0xff] }
 0x371   : > { %v1641_v30 = vadd.f32 %v4632_v45, %v1640_v20  ;;  %2739 = vmatpush3.bf16.msra.mxu0 %v2738_v3  ;;  %v1852_v3 = vld [vmem:[%s3829_s29 + $0x20] sm:$0xff] }
 0x372   : > { %v1720_v63 = vmul.f32 %v1688_v53, %v1646_v52 }
 0x373   : > { %v1719_v54 = vmul.f32 %v1687_v37, %v1641_v30  ;;  %v2651_v22 = vpop.f32.mrb[46].mxu1  ;;  %v1858_v30 = vld [vmem:[%s3829_s29 + $0x50] sm:$0xff] }
 0x374   : > { %v1656_v50 = vadd.f32 %v2651_v22, %v4632_v45  ;;  %v1650_v21 = vpop.f32.mrb[47].mxu1 }
 0x375   : > { %v2740_v19 = vpack.c.bf16 %v1720_v63, %v1719_v54  ;;  %v1651_v9 = vadd.f32 %v4632_v45, %v1650_v21 }
 0x376   : > { %v1722_v12 = vmul.f32 %v1690_v6, %v1656_v50  ;;  %v1859_v50 = vld [vmem:[%s3829_s29 + $0x58] sm:$0xff] }
 0x377   : > { %2741 = vmatprep.subr.bf16.mxu0 %v2740_v19  ;;  %v1721_v40 = vmul.f32 %v1689_v25, %v1651_v9 }
 0x378   : > { %2743 = vmatpush3.bf16.msra.mxu0 %v2742_v26 }
 0x379   : > { %v2744_v7 = vpack.c.bf16 %v1722_v12, %v1721_v40  ;;  %v1860_v12 = vld [vmem:[%s3829_s29 + $0x60] sm:$0xff] }
 0x37b   : > { %2745 = vmatprep.subr.bf16.mxu0 %v2744_v7 }
 0x37c   : > { %2747 = vmatpush3.bf16.msra.mxu0 %v2746_v41 }
 0x37f   : > { %2257 = vmatmul.mubr.msk.f32.vlgmr.msra.gmra.mrb[16].mxu0 %vm1752_vm1, %v3365_v57  ;;  %vm5356_vm1 = vcmp.eq.s32.totalorder %v4627_v18, %v4580_v55 }
 0x380   : > { %2258 = vmatprep.mubr.msk.f32.mxu0 %vm1755_vm2, %v3365_v57  ;;  %vm5357_vm2 = vcmp.eq.s32.totalorder %v4627_v18, %v4578_v51 }
 0x383   : > { %2259 = vmatmul.mubr.msk.f32.gmra.mrb[18].mxu0 %vm1754_vm3, %v3365_v57  ;;  %vm5358_vm3 = vcmp.eq.s32.totalorder %v4640_v29, %v4580_v55 }
 0x384   : > { %2260 = vmatprep.mubr.msk.f32.mxu0 %vm1757_vm4, %v3365_v57  ;;  %vm5359_vm4 = vcmp.eq.s32.totalorder %v4640_v29, %v4578_v51 }
 0x387   : > { %2261 = vmatmul.mubr.msk.f32.gmra.mrb[20].mxu0 %vm1756_vm5, %v3365_v57  ;;  %vm5360_vm5 = vcmp.eq.s32.totalorder %v4654_v58, %v4580_v55 }
 0x388   : > { %2262 = vmatprep.mubr.msk.f32.mxu0 %vm1759_vm6, %v3365_v57  ;;  %vm5361_vm6 = vcmp.eq.s32.totalorder %v4654_v58, %v4578_v51  ;;  %v1850_v58 = vld [vmem:[%s3829_s29 + $0x10] sm:$0xff] }
 0x38b   : > { %2263 = vmatmul.mubr.msk.f32.gmra.mrb[22].mxu0 %vm1758_vm7, %v3365_v57  ;;  %vm5362_vm7 = vcmp.eq.s32.totalorder %v4667_v46, %v4580_v55 }
 0x38c   : > { %2264 = vmatprep.mubr.msk.f32.mxu0 %vm1761_vm8, %v3365_v57  ;;  %vm5363_vm8 = vcmp.eq.s32.totalorder %v4667_v46, %v4578_v51 }
 0x38f   : > { %2265 = vmatmul.mubr.msk.f32.gmra.mrb[24].mxu0 %vm1760_vm9, %v3365_v57  ;;  %vm5364_vm9 = vcmp.eq.s32.totalorder %v4684_v42, %v4580_v55 }
 0x390   : > { %2266 = vmatprep.mubr.msk.f32.mxu0 %vm1763_vm10, %v3365_v57  ;;  %vm5365_vm10 = vcmp.eq.s32.totalorder %v4684_v42, %v4578_v51 }
 0x393   : > { %2267 = vmatmul.mubr.msk.f32.gmra.mrb[26].mxu0 %vm1762_vm11, %v3365_v57  ;;  %vm5366_vm11 = vcmp.eq.s32.totalorder %v4700_v13, %v4580_v55 }
 0x394   : > { %2268 = vmatprep.mubr.msk.f32.mxu0 %vm1765_vm12, %v3365_v57  ;;  %vm5367_vm12 = vcmp.eq.s32.totalorder %v4700_v13, %v4578_v51  ;;  %v1851_v13 = vld [vmem:[%s3829_s29 + $0x18] sm:$0xff] }
 0x397   : > { %2269 = vmatmul.mubr.msk.f32.gmra.mrb[28].mxu0 %vm1764_vm13, %v3365_v57  ;;  %vm5368_vm13 = vcmp.eq.s32.totalorder %v4713_v59, %v4580_v55 }
 0x398   : > { %2270 = vmatprep.mubr.msk.f32.mxu0 %vm5356_vm1, %v3365_v57  ;;  %vm5369_vm1 = vcmp.eq.s32.totalorder %v4729_v61, %v4580_v55 }
 0x39b   : > { %2271 = vmatmul.mubr.msk.f32.gmra.mrb[30].mxu0 %vm5357_vm2, %v3365_v57  ;;  %vm5370_vm2 = vcmp.eq.s32.totalorder %v4729_v61, %v4578_v51 }
 0x39c   : > { %2272 = vmatprep.mubr.msk.f32.mxu0 %vm5358_vm3, %v3365_v57 }
 0x39f   : > { %2273 = vmatmul.mubr.msk.f32.gmra.mrb[32].mxu0 %vm5359_vm4, %v3365_v57 }
 0x3a0   : > { %2274 = vmatprep.mubr.msk.f32.mxu0 %vm5360_vm5, %v3365_v57 }
 0x3a3   : > { %2275 = vmatmul.mubr.msk.f32.gmra.mrb[34].mxu0 %vm5361_vm6, %v3365_v57 }
 0x3a4   : > { %2276 = vmatprep.mubr.msk.f32.mxu0 %vm5362_vm7, %v3365_v57 }
 0x3a7   : > { %2277 = vmatmul.mubr.msk.f32.gmra.mrb[36].mxu0 %vm5363_vm8, %v3365_v57 }
 0x3a8   : > { %2278 = vmatprep.mubr.msk.f32.mxu0 %vm5364_vm9, %v3365_v57 }
 0x3ab   : > { %2279 = vmatmul.mubr.msk.f32.gmra.mrb[38].mxu0 %vm5365_vm10, %v3365_v57 }
 0x3ac   : > { %2280 = vmatprep.mubr.msk.f32.mxu0 %vm5366_vm11, %v3365_v57 }
 0x3af   : > { %2281 = vmatmul.mubr.msk.f32.gmra.mrb[40].mxu0 %vm5367_vm12, %v3365_v57 }
 0x3b0   : > { %2282 = vmatprep.mubr.msk.f32.mxu0 %vm5368_vm13, %v3365_v57 }
 0x3b3   : > { %2283 = vmatmul.mubr.msk.f32.gmra.mrb[42].mxu0 %vm1778_vm0, %v3365_v57 }
 0x3b4   : > { %2284 = vmatprep.mubr.msk.f32.mxu0 %vm5369_vm1, %v3365_v57 }
 0x3b7   : > { %2285 = vmatmul.mubr.msk.f32.gmra.mrb[44].mxu0 %vm5370_vm2, %v3365_v57 }
 0x3b8   : > { %2286 = vmatprep.mubr.msk.f32.mxu0 %vm1783_vm15, %v3365_v57 }
 0x3bb   : > { %2287 = vmatmul.mubr.msk.f32.gmra.mrb[46].mxu0 %vm1782_vm14, %v3365_v57 }
 0x452   : > { %v2444_v44 = vpop.f32.mrb[16].mxu0 }
 0x453   : > { %v2445_v48 = vpop.f32.mrb[17].mxu0 }
 0x454   : > { %v2446_v36 = vadd.f32 %v2445_v48, %v2444_v44  ;;  %v1861_v48 = vld [vmem:[%s3829_s29 + $0x68] sm:$0xff] }
 0x456   : > { %v2009_v47 = vadd.f32 %v2446_v36, %v1848_v32  ;;  %v2447_v38 = vpop.f32.mrb[18].mxu0 }
 0x457   : > { %v2448_v18 = vpop.f32.mrb[19].mxu0 }
 0x458   : > { %2025 = vst [vmem:[%s3829_s29] sm:$0xff] %v2009_v47  ;;  %v2449_v55 = vadd.f32 %v2448_v18, %v2447_v38  ;;  %v1862_v18 = vld [vmem:[%s3829_s29 + $0x70] sm:$0xff] }
 0x45a   : > { %v2010_v45 = vadd.f32 %v2449_v55, %v1849_v8  ;;  %v2450_v29 = vpop.f32.mrb[20].mxu0 }
 0x45b   : > { %v2451_v51 = vpop.f32.mrb[21].mxu0 }
 0x45c   : > { %2026 = vst [vmem:[%s3829_s29 + $0x8] sm:$0xff] %v2010_v45  ;;  %v2452_v57 = vadd.f32 %v2451_v51, %v2450_v29  ;;  %v1863_v51 = vld [vmem:[%s3829_s29 + $0x78] sm:$0xff] }
 0x45e   : > { %v2011_v46 = vadd.f32 %v2452_v57, %v1850_v58  ;;  %v2453_v42 = vpop.f32.mrb[22].mxu0 }
 0x45f   : > { %v2454_v59 = vpop.f32.mrb[23].mxu0 }
 0x460   : > { %2027 = vst [vmem:[%s3829_s29 + $0x10] sm:$0xff] %v2011_v46  ;;  %v2455_v61 = vadd.f32 %v2454_v59, %v2453_v42 }
 0x462   : > { %v2012_v31 = vadd.f32 %v2455_v61, %v1851_v13  ;;  %v2456_v24 = vpop.f32.mrb[24].mxu0 }
 0x463   : > { %v2457_v2 = vpop.f32.mrb[25].mxu0 }
 0x464   : > { %2028 = vst [vmem:[%s3829_s29 + $0x18] sm:$0xff] %v2012_v31  ;;  %v2458_v27 = vadd.f32 %v2457_v2, %v2456_v24 }
 0x466   : > { %v2013_v26 = vadd.f32 %v2458_v27, %v1852_v3  ;;  %v2459_v33 = vpop.f32.mrb[26].mxu0 }
 0x467   : > { %v2460_v41 = vpop.f32.mrb[27].mxu0 }
 0x468   : > { %2029 = vst [vmem:[%s3829_s29 + $0x20] sm:$0xff] %v2013_v26  ;;  %v2461_v5 = vadd.f32 %v2460_v41, %v2459_v33 }
 0x46a   : > { %v2014_v34 = vadd.f32 %v2461_v5, %v1853_v16  ;;  %v2462_v28 = vpop.f32.mrb[28].mxu0 }
 0x46b   : > { %v2463_v11 = vpop.f32.mrb[29].mxu0 }
 0x46c   : > { %2030 = vst [vmem:[%s3829_s29 + $0x28] sm:$0xff] %v2014_v34  ;;  %v2464_v0 = vadd.f32 %v2463_v11, %v2462_v28 }
 0x46e   : > { %v2015_v15 = vadd.f32 %v2464_v0, %v1854_v14  ;;  %v2465_v17 = vpop.f32.mrb[30].mxu0 }
 0x46f   : > { %v2466_v60 = vpop.f32.mrb[31].mxu0 }
 0x470   : > { %2031 = vst [vmem:[%s3829_s29 + $0x30] sm:$0xff] %v2015_v15  ;;  %v2467_v4 = vadd.f32 %v2466_v60, %v2465_v17 }
 0x472   : > { %v2016_v1 = vadd.f32 %v2467_v4, %v1855_v56  ;;  %v2468_v39 = vpop.f32.mrb[32].mxu0 }
 0x473   : > { %v2469_v23 = vpop.f32.mrb[33].mxu0 }
 0x474   : > { %2032 = vst [vmem:[%s3829_s29 + $0x38] sm:$0xff] %v2016_v1  ;;  %v2470_v43 = vadd.f32 %v2469_v23, %v2468_v39 }
 0x476   : > { %v2017_v62 = vadd.f32 %v2470_v43, %v1856_v49  ;;  %v2471_v10 = vpop.f32.mrb[34].mxu0 }
 0x477   : > { %v2472_v53 = vpop.f32.mrb[35].mxu0 }
 0x478   : > { %2033 = vst [vmem:[%s3829_s29 + $0x40] sm:$0xff] %v2017_v62  ;;  %v2473_v52 = vadd.f32 %v2472_v53, %v2471_v10 }
 0x47a   : > { %v2018_v20 = vadd.f32 %v2473_v52, %v1857_v35  ;;  %v2474_v37 = vpop.f32.mrb[36].mxu0 }
 0x47b   : > { %v2475_v63 = vpop.f32.mrb[37].mxu0 }
 0x47c   : > { %2034 = vst [vmem:[%s3829_s29 + $0x48] sm:$0xff] %v2018_v20  ;;  %v2476_v54 = vadd.f32 %v2475_v63, %v2474_v37 }
 0x47e   : > { %v2019_v22 = vadd.f32 %v2476_v54, %v1858_v30  ;;  %v2477_v6 = vpop.f32.mrb[38].mxu0 }
 0x47f   : > { %v2478_v21 = vpop.f32.mrb[39].mxu0 }
 0x480   : > { %2035 = vst [vmem:[%s3829_s29 + $0x50] sm:$0xff] %v2019_v22  ;;  %v2479_v25 = vadd.f32 %v2478_v21, %v2477_v6 }
 0x482   : > { %v2020_v19 = vadd.f32 %v2479_v25, %v1859_v50  ;;  %v2480_v9 = vpop.f32.mrb[40].mxu0 }
 0x483   : > { %v2481_v40 = vpop.f32.mrb[41].mxu0 }
 0x484   : > { %2036 = vst [vmem:[%s3829_s29 + $0x58] sm:$0xff] %v2020_v19  ;;  %v2482_v7 = vadd.f32 %v2481_v40, %v2480_v9 }
 0x486   : > { %v2021_v44 = vadd.f32 %v2482_v7, %v1860_v12  ;;  %v2483_v32 = vpop.f32.mrb[42].mxu0 }
 0x487   : > { %v2484_v36 = vpop.f32.mrb[43].mxu0 }
 0x488   : > { %2037 = vst [vmem:[%s3829_s29 + $0x60] sm:$0xff] %v2021_v44  ;;  %v2485_v47 = vadd.f32 %v2484_v36, %v2483_v32 }
 0x48a   : > { %v2022_v38 = vadd.f32 %v2485_v47, %v1861_v48  ;;  %v2486_v8 = vpop.f32.mrb[44].mxu0 }
 0x48b   : > { %v2487_v55 = vpop.f32.mrb[45].mxu0 }
 0x48c   : > { %2038 = vst [vmem:[%s3829_s29 + $0x68] sm:$0xff] %v2022_v38  ;;  %v2488_v45 = vadd.f32 %v2487_v55, %v2486_v8 }
 0x48e   : > { %v2023_v29 = vadd.f32 %v2488_v45, %v1862_v18  ;;  %v2489_v58 = vpop.f32.mrb[46].mxu0 }
 0x48f   : > { %v2490_v57 = vpop.f32.mrb[47].mxu0 }
 0x490   : > { %2039 = vst [vmem:[%s3829_s29 + $0x70] sm:$0xff] %v2023_v29  ;;  %v2491_v46 = vadd.f32 %v2490_v57, %v2489_v58 }
 0x492   : > { %v2024_v42 = vadd.f32 %v2491_v46, %v1863_v51 }
 0x494   : > { %2040 = vst [vmem:[%s3829_s29 + $0x78] sm:$0xff] %v2024_v42 }
 0x495 PF: > { %s5371_s4 = sld [smem:[#allocation30_spill]]  ;;  %s5373_s6 = sld [smem:[#allocation31_spill]] }
 0x496   : > { %s5374_s18 = sld [smem:[#allocation90_spill]]  ;;  %s2055_s19 = sshll.u32 %s3829_s29, 4  ;;  %s4993_s19 = int_to_ptr.vmem [resolvable:$true] %s2055_s19 }
 0x497   : > { %s4997_s15 = scalar_lea.sflag [#allocation6], %s528_s28  ;;  %s3195_s8 = scalar_lea.vmem %s4993_s19, 2048 }
 0x498   : > { %p3196_p10 = scmp.ne.s32.totalorder %s4993_s19, %s3195_s8  ;;  %s3366_s9 = smov [#allocation12]  }
 0x499   : > { %s3199_s23 = sshll.u32 %s3366_s9, 4  ;;  %s3200_s23 = int_to_ptr.vmem [resolvable:$false] %s3199_s23 }
 0x49a   : > { %s3201_s10 = scalar_lea.vmem %s3200_s23, 4096  ;;  %p3202_p2 = scmp.lt.s32.totalorder %s4993_s19, %s3200_s23 }
 0x49b   : > { %s2315_s25 = sshll.u32 %s5371_s4, 11  ;;  %p5376_p9 = scmp.ne.s32.totalorder %s5373_s6, 0 }
 0x49c   : > { %s5375_s5 = smov %s5374_s18  ;;  %s4990_s12 = scalar_lea.hbm %s5374_s18, %s2315_s25 }
 0x49d   : > { %p3197_p12 = pnand %p3196_p10, %p5376_p9  ;;  %p3203_p1 = scmp.lt.s32.totalorder %s3201_s10, %s3195_s8 }
 0x49f   : > { %p3198_p6 = pneg %p3197_p12  ;;  %p3204_p13 = por %p3203_p1, %p3202_p2 }
 0x4a1   : > { %p3205_p7 = pnand %p3204_p13, %p3198_p6 }
 0x4a3   : > { %3208 = shalt.err (!%p3205_p7)
}
 0x4a4   : > { %s3209_s28 = scalar_lea.hbm %s4990_s12, 2048  ;;  %s3213_s24 = scalar_lea.hbm %s5375_s5, 4096 }
 0x4a5   : > { %p3210_p0 = scmp.ne.s32.totalorder %s4990_s12, %s3209_s28  ;;  %p3214_p5 = scmp.lt.u32.totalorder %s4990_s12, %s5375_s5 }
 0x4a6   : > { %p3215_p11 = scmp.lt.u32.totalorder %s3213_s24, %s3209_s28  ;;  %p3217_p10 = scmp.lt.u32.totalorder %s3209_s28, %s4990_s12 }
 0x4a7   : > { %p3211_p4 = pnand %p3210_p0, %p5376_p9 }
 0x4a8   : > { %p3216_p8 = por %p3215_p11, %p3214_p5 }
 0x4a9   : > { %p3212_p3 = pneg %p3211_p4 }
 0x4aa   : > { %p3218_p12 = por %p3217_p10, %p3216_p8 }
 0x4ac   : > { %p3219_p6 = pnand %p3218_p12, %p3212_p3 }
 0x4ae   : > { %3222 = shalt.err (!%p3219_p6)
}
 0x4af   : > { %s3367_s4 = smov 128   ;;  %s3368_s2 = smov 8  }
 0x4b0   : > { %2784 = dma.vmem_to_hbm [thread:$0]  (%p5376_p9), %s4993_s19, 2048, %s4990_s12, %s4997_s15, %s3367_s4, %s3367_s4, %s3368_s2  }
 0x4b1 PF: > { %s5377_s25 = sld [smem:[#allocation27_spill]]  ;;  %s5378_s30 = sld [smem:[#allocation32_spill]] }
 0x4b2   : > { %p2817_p2 = scmp.ge.s32.totalorder %s3355_s22, 2 }
 0x4b7   : > { %s2070_s26 = sand.u32 1, %s5377_s25   ;;  %p5379_p1 = scmp.ne.s32.totalorder %s5378_s30, 0 }
 0x4b8   : > { %s2071_s18 = scalar_lea.sflag [#allocation6], %s2070_s26 }
 0x4b9   : > { %p2809_p13 = pnand %p2817_p2, %p5379_p1 }
 0x4bb   : > { %3298 = dma.done.wait (!%p2809_p13), %s2071_s18, 2048  }
 0x4bc   : > { %3300 = vsyncadd (!%p2809_p13), %s2071_s18, 4294965248  ;;  %s34_s22 = sadd.s32 1, %s3355_s22   ;;  %s5381_s0 = sld [smem:[#allocation28_spill]] }
 0x4bd   : > { %p5026_p7 = scmp.ge.s32.totalorder %s34_s22, 8   ;;  %s5382_s6 = sld [smem:[#allocation36_spill]] }
 0x4be   : > { %s5383_s19 = sld [smem:[#allocation35_spill]]  ;;  %s5384_s9 = sld [smem:[#allocation33_spill]] }
 0x4bf   : > { %s5385_s23 = sld [smem:[#allocation34_spill]]  ;;  %s5386_s10 = smov %s3311_s11 }
 0x4c0   : > { %s5388_s12 = smov %s3319_s13  ;;  %s5389_s13 = smov %s3323_s14 }
 0x4c1   : > { %s5390_s14 = smov %s3669_s7  ;;  %s5391_s15 = smov %s3331_s16 }
 0x4c2   : > { %s5392_s16 = smov %s3335_s17  ;;  %s5394_s18 = smov %s3347_s20 }
 0x4c3   : > { %s5387_s11 = smov %s5382_s6  ;;  %33 = sbr.rel (!%p5026_p7) target bundleno = 30 (0x1e), region = 125 }
 0x4c4   : > { %s5393_s17 = smov %s5383_s19  ;;  %s5395_s19 = smov %s3351_s21 }
 0x4c5   : > { %s5396_s20 = smov %s5384_s9  ;;  %s5397_s21 = smov %s5385_s23 }
 0x4ca   :  { %2076 = vsyncpa [#allocation5], 1 }
 0x4cb   :  { %2078 = vsyncpa [#allocation5 + $0x1], 1 }
 0x4cc   :  { %2079 = vsyncpa [#allocation8], 1 }
 0x4cd   :  { %2081 = vsyncpa [#allocation8 + $0x1], 1 }
 0x4ce   :  { %2082 = vsyncpa [#allocation11], 1 }
 0x4cf   :  { %2083 = vsyncpa [#allocation6], 1 }
 0x4d0   :  { %2085 = vsyncpa [#allocation6 + $0x1], 1 }

</bundles_post_ra>
